<compile_context>
chip_gen: v7x
topology: tpu7x:2x2x1
jax: 0.10.0
libtpu: 0.0.40
codegen_flags: <defaults>
</compile_context>

<pallas_src>
import jax
import jax.numpy as jnp
from jax.experimental import pallas as pl
from jax.experimental.pallas import tpu as pltpu


def _round_up(x, m):
    return ((x + m - 1) // m) * m


# ------------------------------- Pallas kernel ------------------------------ #
def _matmul_bias_kernel(x_ref, w_ref, b_ref, o_ref, acc_ref):
    k = pl.program_id(2)

    @pl.when(k == 0)
    def _():
        acc_ref[...] = jnp.zeros_like(acc_ref)

    acc_ref[...] += jnp.dot(
        x_ref[...], w_ref[...], preferred_element_type=jnp.float32
    )

    @pl.when(k == pl.num_programs(2) - 1)
    def _():
        # Bias is stored f32 -> add exactly once, cast only on the final store.
        o_ref[...] = (acc_ref[...] + b_ref[...]).astype(o_ref.dtype)


def pallas_linear(x, w_pad, b_pad, *, n_out, tn, tk, out_dtype):
    """y = x @ w_pad + b_pad with a 3-D tiled, auto-pipelined Pallas matmul.

    w_pad [Kp, Np] is already cast to the compute dtype and zero-padded to
    tile boundaries at model-construction time; b_pad is [1, Np] float32.
    Only x is cast / padded per call.
    """
    M, K = x.shape
    Kp, Np = w_pad.shape
    compute_dtype = w_pad.dtype
    bpe = jnp.dtype(compute_dtype).itemsize
    out_b = jnp.dtype(out_dtype).itemsize
    sub = 16 if bpe == 2 else 8  # bf16 packs 16 sublanes per vreg

    if x.dtype != compute_dtype:
        x = x.astype(compute_dtype)

    # M tile: as large as the shape allows, sublane-aligned, capped at 512.
    tm = min(512, _round_up(M, sub))
    Mp = _round_up(M, tm)

    # Guarantee >= 2 parallel (i, j) blocks so v7x's second TensorCore gets
    # work (no-op on single-TC v5e/v6e).  Prefer splitting the M axis; tn only
    # shrinks by powers of two so it always still divides the pre-padded Np.
    while (Mp // tm) * (Np // tn) < 2:
        if tm >= 2 * sub:
            tm = _round_up(tm // 2, sub)
        elif tn > 128:
            tn //= 2
        else:
            break
        Mp = _round_up(M, tm)

    if (Mp, Kp) != (M, K):
        # Zero K-padding contributes 0 to the accumulation (w is zero-padded).
        x = jnp.pad(x, ((0, Mp - M), (0, Kp - K)))

    grid = (Mp // tm, Np // tn, Kp // tk)

    # Double-buffered operand/output tiles + resident f32 accumulator.
    footprint = (
        2 * (tm * tk * bpe + tk * tn * bpe + tm * tn * out_b + tn * 4)
        + tm * tn * 4
    )
    vmem_limit = int(min(56 << 20, max(32 << 20, 2 * footprint)))

    cost = pl.CostEstimate(
        flops=2 * Mp * Np * Kp,
        transcendentals=0,
        bytes_accessed=int(
            Mp * Kp * bpe + Kp * Np * bpe + Mp * Np * out_b + Np * 4
        ),
    )

    out = pl.pallas_call(
        _matmul_bias_kernel,
        out_shape=jax.ShapeDtypeStruct((Mp, Np), out_dtype),
        grid=grid,
        in_specs=[
            pl.BlockSpec((tm, tk), lambda i, j, k: (i, k)),
            # TODO(synk): add pipeline_mode=pl.Buffered(3) on the weight spec
            # if v7x profiling shows exposed weight DMA.
            pl.BlockSpec((tk, tn), lambda i, j, k: (k, j)),
            pl.BlockSpec((1, tn), lambda i, j, k: (0, j)),
        ],
        out_specs=pl.BlockSpec((tm, tn), lambda i, j, k: (i, j)),
        scratch_shapes=[pltpu.VMEM((tm, tn), jnp.float32)],
        compiler_params=pltpu.CompilerParams(
            dimension_semantics=("parallel", "parallel", "arbitrary"),
            vmem_limit_bytes=vmem_limit,
        ),
        cost_estimate=cost,
    )(x, w_pad, b_pad)

    if (Mp, Np) != (M, n_out):
        out = out[:M, :n_out]
    return out


# ----------------------------- BaseServer analogue -------------------------- #
class BaseServer:
    """JAX/Pallas analogue of aijack's BaseServer: forward delegates to the
    server model; the server model's compute runs in a Pallas TPU kernel."""

    def __init__(self, clients, server_model, server_id=0):
        self.clients = clients
        self.server_id = server_id
        self.server_model = server_model  # callable: x -> y (Pallas-backed)
        self.num_clients = len(clients)

    def forward(self, x):
        return self.server_model(x)

    def __call__(self, x):
        return self.forward(x)

    # Protocol stubs mirroring the reference module (no tensor compute).
    def action(self):
        pass

    def update(self):
        pass

    def distribtue(self):
        pass

    # TODO(synk): train()/eval() only toggle module mode in the reference; the
    # synthetic linear server model is stateless, so delegate if present.
    def train(self):
        if hasattr(self.server_model, "train"):
            self.server_model.train()

    def eval(self):
        if hasattr(self.server_model, "eval"):
            self.server_model.eval()


def make_server_model(key, d_in, d_out, dtype=jnp.float32,
                      compute_dtype=jnp.bfloat16):
    """Deterministic synthetic Linear server model backed by the Pallas kernel.

    All weight-side work (compute-dtype cast, tile padding) happens here,
    once; the per-call hot path only casts/pads the activations.
    bf16 operands with f32 MXU accumulation by default.
    """
    if compute_dtype is None:
        compute_dtype = dtype
    k_w, _ = jax.random.split(key)
    # PyTorch nn.Linear weight is (out, in); store transposed (in, out).
    w_t = (jax.random.normal(k_w, (d_in, d_out), jnp.float32) * 0.02).astype(dtype)
    b = jnp.zeros((d_out,), jnp.float32)

    bpe = jnp.dtype(compute_dtype).itemsize
    # Lane-dense N tile; dtype-aware K depth (bf16 halves bytes/elem -> 2x K).
    tn = min(512, _round_up(d_out, 128))
    tk = min(1024 if bpe == 2 else 512, _round_up(d_in, 128))
    Kp, Np = _round_up(d_in, tk), _round_up(d_out, tn)

    w_cd = w_t.astype(compute_dtype)                              # hoisted cast
    w_pad = jnp.pad(w_cd, ((0, Kp - d_in), (0, Np - d_out)))      # hoisted pad
    b_pad = jnp.pad(b, (0, Np - d_out)).reshape(1, Np)

    @jax.jit
    def model(x):
        M = x.shape[0]
        # Skinny-M / sub-tile outputs are weight-bandwidth-bound: a fused XLA
        # gemm beats a custom launch.  Same compute dtype for consistency.
        if M <= 64 or M * d_out < 8 * 128:
            y = jnp.dot(x.astype(compute_dtype), w_cd,
                        preferred_element_type=jnp.float32)
            return (y + b).astype(x.dtype)
        return pallas_linear(x, w_pad, b_pad, n_out=d_out, tn=tn, tk=tk,
                             out_dtype=x.dtype)

    return model, (w_t, b)


if __name__ == "__main__":
    key = jax.random.PRNGKey(0)
    k_x, k_m = jax.random.split(key)

    # Small, tile-friendly demo shapes: M large enough to take the Pallas
    # path, K split across two reduction steps (f32) to exercise the
    # accumulator, N lane-dense (multiple of 128) so no output slice is needed.
    B, D_IN, D_OUT = 256, 1024, 256
    x = jax.random.normal(k_x, (B, D_IN), jnp.float32)

    # f32-operand path through the Pallas kernel (tight reference check).
    f32_model, (w_t, b) = make_server_model(
        k_m, D_IN, D_OUT, compute_dtype=jnp.float32
    )
    server = BaseServer(
        clients=["client_0", "client_1"], server_model=f32_model, server_id=0
    )
    y = jax.block_until_ready(server(x))

    y_ref = jnp.dot(x, w_t, precision=jax.lax.Precision.HIGHEST) + b
    assert y.shape == (B, D_OUT)
    assert jnp.allclose(y, y_ref, atol=2e-4, rtol=2e-4)

    # Default path: bf16 operands, f32 MXU accumulation (same Pallas kernel).
    bf16_model, _ = make_server_model(k_m, D_IN, D_OUT)
    y_bf16 = jax.block_until_ready(BaseServer(["c0"], bf16_model)(x))
    assert jnp.allclose(y_bf16, y_ref, atol=5e-2, rtol=5e-2)

    # Skinny-M batch takes the fused-XLA fallback (weight-bandwidth-bound).
    y_small = jax.block_until_ready(server(x[:16]))
    assert jnp.allclose(y_small, y_ref[:16], atol=1e-3, rtol=1e-3)

    print("KERNEL_OK")
</pallas_src>

<mosaic_0001>
module attributes {stable_mosaic.version = 11 : i64} {
  func.func @_matmul_bias_kernel(%arg0: i32, %arg1: i32, %arg2: i32, %arg3: memref<128x512xf32, #tpu.memory_space<vmem>>, %arg4: memref<512x256xf32, #tpu.memory_space<vmem>>, %arg5: memref<1x256xf32, #tpu.memory_space<vmem>>, %arg6: memref<128x256xf32, #tpu.memory_space<vmem>>, %arg7: memref<128x256xf32, #tpu.memory_space<vmem>>) attributes {dimension_semantics = [#tpu.dimension_semantics<parallel>, #tpu.dimension_semantics<parallel>, #tpu.dimension_semantics<arbitrary>], iteration_bounds = array<i64: 2, 1, 2>, scalar_prefetch = 0 : i64, scratch_operands = 1 : i64, tpu.core_type = #tpu.core_type<tc>, window_params = [{transform_indices = @transform_0, window_bounds = array<i64: 128, 512>}, {transform_indices = @transform_1, window_bounds = array<i64: 512, 256>}, {transform_indices = @transform_2, window_bounds = array<i64: 1, 256>}, {transform_indices = @transform_3, window_bounds = array<i64: 128, 256>}]} {
    %c0_i32 = arith.constant 0 : i32
    %0 = arith.cmpi eq, %arg2, %c0_i32 : i32
    %1 = arith.extui %0 : i1 to i32
    %c0_i32_0 = arith.constant 0 : i32
    %2 = arith.cmpi ne, %1, %c0_i32_0 : i32
    scf.if %2 {
      %cst_9 = arith.constant 0.000000e+00 : f32
      %12 = vector.broadcast %cst_9 : f32 to vector<128x256xf32>
      %c0_10 = arith.constant 0 : index
      %c0_11 = arith.constant 0 : index
      %13 = vector.load %arg7[%c0_10, %c0_11] : memref<128x256xf32, #tpu.memory_space<vmem>>, vector<128x256xf32>
      tpu.vector_store %arg7[%c0_10, %c0_11], %12 {strides = array<i32>} : memref<128x256xf32, #tpu.memory_space<vmem>>, vector<128x256xf32>,
    } else {
    }
    %c0 = arith.constant 0 : index
    %c0_1 = arith.constant 0 : index
    %3 = vector.load %arg7[%c0, %c0_1] : memref<128x256xf32, #tpu.memory_space<vmem>>, vector<128x256xf32>
    %c0_2 = arith.constant 0 : index
    %c0_3 = arith.constant 0 : index
    %4 = vector.load %arg3[%c0_2, %c0_3] : memref<128x512xf32, #tpu.memory_space<vmem>>, vector<128x512xf32>
    %c0_4 = arith.constant 0 : index
    %c0_5 = arith.constant 0 : index
    %5 = vector.load %arg4[%c0_4, %c0_5] : memref<512x256xf32, #tpu.memory_space<vmem>>, vector<512x256xf32>
    %cst = arith.constant dense<0.000000e+00> : vector<128x256xf32>
    %6 = tpu.matmul %4, %5, %cst {dimension_numbers = #tpu.dot_dimension_numbers<[1], [0], [0], [1], [0, 0, 1, 1], [], []>} : vector<128x512xf32>, vector<512x256xf32>, vector<128x256xf32> -> vector<128x256xf32>
    %7 = arith.addf %3, %6 : vector<128x256xf32>
    %c0_6 = arith.constant 0 : index
    %c0_7 = arith.constant 0 : index
    %8 = vector.load %arg7[%c0_6, %c0_7] : memref<128x256xf32, #tpu.memory_space<vmem>>, vector<128x256xf32>
    tpu.vector_store %arg7[%c0_6, %c0_7], %7 {strides = array<i32>} : memref<128x256xf32, #tpu.memory_space<vmem>>, vector<128x256xf32>,
    %c1_i32 = arith.constant 1 : i32
    %9 = arith.cmpi eq, %arg2, %c1_i32 : i32
    %10 = arith.extui %9 : i1 to i32
    %c0_i32_8 = arith.constant 0 : i32
    %11 = arith.cmpi ne, %10, %c0_i32_8 : i32
    scf.if %11 {
      %c0_9 = arith.constant 0 : index
      %c0_10 = arith.constant 0 : index
      %12 = vector.load %arg7[%c0_9, %c0_10] : memref<128x256xf32, #tpu.memory_space<vmem>>, vector<128x256xf32>
      %c0_11 = arith.constant 0 : index
      %c0_12 = arith.constant 0 : index
      %13 = vector.load %arg5[%c0_11, %c0_12] : memref<1x256xf32, #tpu.memory_space<vmem>>, vector<1x256xf32>
      %14 = vector.broadcast %13 : vector<1x256xf32> to vector<128x256xf32>
      %15 = arith.addf %12, %14 : vector<128x256xf32>
      %c0_13 = arith.constant 0 : index
      %c0_14 = arith.constant 0 : index
      %16 = vector.load %arg6[%c0_13, %c0_14] : memref<128x256xf32, #tpu.memory_space<vmem>>, vector<128x256xf32>
      tpu.vector_store %arg6[%c0_13, %c0_14], %15 {strides = array<i32>} : memref<128x256xf32, #tpu.memory_space<vmem>>, vector<128x256xf32>,
    } else {
    }
    return
  }
  func.func @transform_0(%arg0: i32, %arg1: i32, %arg2: i32) -> (i32, i32) {
    %c0_i32 = arith.constant 0 : i32
    return %arg0, %arg2 : i32, i32
  }
  func.func @transform_1(%arg0: i32, %arg1: i32, %arg2: i32) -> (i32, i32) {
    %c0_i32 = arith.constant 0 : i32
    return %arg2, %arg1 : i32, i32
  }
  func.func @transform_2(%arg0: i32, %arg1: i32, %arg2: i32) -> (i32, i32) {
    %c0_i32 = arith.constant 0 : i32
    %c0_i32_0 = arith.constant 0 : i32
    return %c0_i32, %arg1 : i32, i32
  }
  func.func @transform_3(%arg0: i32, %arg1: i32, %arg2: i32) -> (i32, i32) {
    %c0_i32 = arith.constant 0 : i32
    return %arg0, %arg1 : i32, i32
  }
}

</mosaic_0001>

<bundles_post_ra>
// kernel: model.1
= control target key start
LH: loop header
LB: loop body
LE: loop exit
PB: predicated region body
PF: predicated region fallthrough
CT: control target
= control target key end

     0   :  { %s2380_s0 = inlined_call_operand.hbm [shape: f32[256,1024], index: 0, kind: input, shape index: {}]   ;;  %s2381_s1 = inlined_call_operand.hbm [shape: f32[1024,256], index: 1, kind: input, shape index: {}]   ;;  %s2382_s2 = inlined_call_operand.vmem [shape: f32[1,256], index: 2, kind: input, shape index: {}]   ;;  %s2383_s3 = inlined_call_operand.hbm [shape: f32[256,256], index: 3, kind: output, shape index: {}]  }
   0x1   :  { %2392 = sst [smem:[#allocation16_spill]] %s2382_s2 }
   0x2   :  { %2393 = sst [smem:[#allocation17_spill]] %s2383_s3 }
   0x3   :  { %8 = vsyncpa [#allocation4], 0 }
   0x4   :  { %10 = vsyncpa [#allocation4 + $0x1], 0 }
   0x5   :  { %11 = vsyncpa [#allocation7], 0 }
   0x6   :  { %13 = vsyncpa [#allocation7 + $0x1], 0 }
   0x7   :  { %14 = vsyncpa [#allocation5], 0 }
   0x8   :  { %16 = vsyncpa [#allocation5 + $0x1], 0  ;;  %s1764_s12 = smov 0   ;;  %s1766_s13 = smov 0  }
   0x9   :  { %s1768_s14 = smov 0   ;;  %s1770_s15 = smov 0  }
   0xa   :  { %s1772_s16 = smov 0   ;;  %s1774_s17 = smov 0  }
   0xb   :  { %s1776_s18 = smov 0   ;;  %s1778_s19 = smov 0  }
   0xc   :  { %s1780_s20 = smov 0   ;;  %s1782_s21 = smov 0  }
   0xd   :  { %s1784_s22 = smov 0   ;;  %s1786_s23 = smov 0  }
   0xe   :  { %s1788_s24 = smov 0   ;;  %s1790_s25 = smov 0  }
   0xf LB: > { %2394 = sst [smem:[#allocation12_spill]] %s1715_s21  ;;  %s34_s26 = sadd.s32 1, %s1723_s23  ;;  %s1731_s25 = sphi %s1790_s25, %s22_s25   ;;  %s1727_s24 = sphi %s1788_s24, %s2435_s24   ;;  %s1723_s23 = sphi %s1786_s23, %s2434_s23   ;;  %s1719_s22 = sphi %s1784_s22, %s2433_s22   ;;  %s1715_s21 = sphi %s1782_s21, %s2432_s21   ;;  %s1711_s20 = sphi %s1780_s20, %s2431_s20   ;;  %s1707_s19 = sphi %s1778_s19, %s2430_s19   ;;  %s1703_s18 = sphi %s1776_s18, %s2429_s18   ;;  %s1699_s17 = sphi %s1774_s17, %s2428_s17   ;;  %s1695_s16 = sphi %s1772_s16, %s2427_s16   ;;  %s1691_s15 = sphi %s1770_s15, %s2426_s15   ;;  %s1687_s14 = sphi %s1768_s14, %s2425_s14   ;;  %s1683_s13 = sphi %s1766_s13, %s2424_s13   ;;  %s1679_s12 = sphi %s1764_s12, %s2423_s12  }
  0x10   : > { %2395 = sst [smem:[#allocation13_spill]] %s1719_s22  ;;  %s41_s27 = sadd.s32 1, %s1727_s24 }
  0x11   : > { %p35_p0 = scmp.ge.s32.totalorder %s34_s26, 2  ;;  %s50_s28 = sadd.s32 1, %s1711_s20 }
  0x12   : > { %p57_p1 = scmp.ne.s32.totalorder %s1711_s20, %s1707_s19  ;;  %p2388_p2 = scmp.eq.s32.totalorder %s1731_s25, 0 }
  0x13   : > { %s2437_s26 = smov (%p35_p0, %s34_s26), 0  ;;  %s2439_s27 = smov (!%p35_p0, %s41_s27), %s1727_s24 }
  0x14   : > { %2396 = sst [smem:[#allocation14_spill]] %s2437_s26  ;;  %s1845_s29 = ssub.s32 %s1723_s23, %s2437_s26 }
  0x15   : > { %p1849_p3 = por %p2388_p2, %p57_p1  ;;  %p43_p4 = scmp.ge.s32.totalorder %s2439_s27, 2 }
  0x16   : > { %s132_s4 = sadd.s32 1, %s1687_s14  ;;  %p2387_p6 = scmp.lt.s32.totalorder %s1731_s25, 4 }
  0x17   : > { %s2441_s27 = smov (%p43_p4, %s2439_s27), 0  ;;  %s177_s5 = sand.u32 1, %s1711_s20  }
  0x18   : > { %2398 = sst [smem:[#allocation15_spill]] %s2441_s27  ;;  %s45_s6 = ssub.s32 %s1727_s24, %s2441_s27 }
  0x19   : > { %s47_s7 = sor.u32 %s1845_s29, %s45_s6  ;;  %p130_p7 = scmp.eq.s32.totalorder %s45_s6, 0 }
  0x1a   : > { %p48_p8 = scmp.eq.s32.totalorder %s47_s7, 0  ;;  %s1196_s8 = sshll.u32 %s177_s5, 9 }
  0x1b   : > { %s1864_s9 = scalar_select %p130_p7, %s1687_s14, %s132_s4  }
  0x1c   : > { %s1867_s10 = scalar_select %p48_p8, %s1711_s20, %s50_s28  }
  0x1d   : > { %s1198_s11 = sshll.u32 %s1723_s23, 2  ;;  %s1217_s26 = sshll.u32 %s1727_s24, 7 }
  0x1e   : > { %s181_s3 = scalar_lea.vmem [#allocation3], %s1196_s8  ;;  %s188_s2 = sadd.s32 %s1217_s26, %s1198_s11 }
  0x1f   : > { %s191_s22 = sshll.u32 %s181_s3, 4  ;;  %s1200_s21 = sshll.u32 %s188_s2, 7  ;;  %s1871_s22 = int_to_ptr.vmem [resolvable:$true] %s191_s22 }
  0x20   : > { %p1877_p9 = pnand %p2387_p6, %p1849_p3  ;;  %s1884_s28 = scalar_lea.hbm %s2380_s0, %s1200_s21 }
  0x21   : > { %p1205_p10 = scmp.ge.s32.totalorder %s1731_s25, 1  ;;  %s1887_s3 = scalar_lea.sflag [#allocation4], %s177_s5 }
  0x22   : > { %s1521_s2 = scalar_lea.hbm %s1884_s28, 8192  ;;  %p1523_p12 = pneg %p1877_p9 }
  0x23   : > { %p1522_p11 = scmp.ne.s32.totalorder %s1884_s28, %s1521_s2  ;;  %s1526_s21 = scalar_lea.hbm %s2380_s0, 32768 }
  0x24   : > { %p1527_p1 = scmp.lt.u32.totalorder %s1884_s28, %s2380_s0  ;;  %p1528_p3 = scmp.lt.u32.totalorder %s1526_s21, %s1521_s2 }
  0x25   : > { %p1524_p13 = pnand %p1523_p12, %p1522_p11  ;;  %p1530_p7 = scmp.lt.u32.totalorder %s1521_s2, %s1884_s28 }
  0x26   : > { %p1529_p4 = por %p1528_p3, %p1527_p1 }
  0x27   : > { %p1525_p0 = pneg %p1524_p13 }
  0x28   : > { %p1531_p8 = por %p1530_p7, %p1529_p4 }
  0x2a   : > { %p1532_p6 = pnand %p1531_p8, %p1525_p0 }
  0x2c   : > { %1535 = shalt.err (!%p1532_p6)
}
  0x2d   : > { %s1536_s5 = scalar_lea.vmem %s1871_s22, 8192  ;;  %s1733_s11 = smov [#allocation3]  }
  0x2e   : > { %p1537_p11 = scmp.ne.s32.totalorder %s1871_s22, %s1536_s5  ;;  %s1541_s6 = sshll.u32 %s1733_s11, 4  ;;  %s1542_s6 = int_to_ptr.vmem [resolvable:$false] %s1541_s6 }
  0x2f   : > { %s1543_s7 = scalar_lea.vmem %s1542_s6, 16384  ;;  %p1544_p5 = scmp.lt.s32.totalorder %s1871_s22, %s1542_s6 }
  0x30   : > { %p1539_p13 = pnand %p1537_p11, %p1523_p12  ;;  %p1545_p1 = scmp.lt.s32.totalorder %s1543_s7, %s1536_s5 }
  0x32   : > { %p1540_p2 = pneg %p1539_p13  ;;  %p1546_p3 = por %p1545_p1, %p1544_p5 }
  0x34   : > { %p1547_p4 = pnand %p1546_p3, %p1540_p2 }
  0x36   : > { %1550 = shalt.err (!%p1547_p4)
}
  0x37   : > { %s1734_s2 = smov 1024   ;;  %s1735_s26 = smov 512  }
  0x38   : > { %s1736_s30 = smov 32   ;;  %p223_p2 = scmp.lt.s32.totalorder %s1731_s25, 5 }
  0x39   : > { %1391 = dma.hbm_to_vmem [thread:$0]  (!%p1877_p9), %s1884_s28, 8192, %s1871_s22, %s1887_s3, %s1734_s2, %s1735_s26, %s1736_s30  }
  0x3a   : > { %p1918_p5 = pnand %p1205_p10, %p223_p2  ;;  %s1191_s4 = sadd.s32 4294967295, %s1731_s25  }
  0x3b   : > { %s1192_s8 = sadd.s32 4294967294, %s1731_s25   ;;  %p64_p6 = scmp.eq.s32.totalorder %s1191_s4, 0 }
  0x3c   : > { %p76_p12 = scmp.eq.s32.totalorder %s1845_s29, 0  ;;  %s78_s5 = sadd.s32 1, %s1699_s17 }
  0x3d   : > { %p85_p0 = scmp.ne.s32.totalorder %s1699_s17, %s1695_s16  ;;  %p2401_p7 = scmp.ne.s32.totalorder %s1707_s19, %s1703_s18 }
  0x3e   : > { %p91_p9 = scmp.ne.s32.totalorder %s1695_s16, %s1691_s15  ;;  %p2403_p10 = scmp.eq.s32.totalorder %s1731_s25, 0 }
  0x3f   : > { %p1931_p8 = por %p64_p6, %p2401_p7  ;;  %p142_p1 = scmp.ne.s32.totalorder %s1687_s14, %s1683_s13 }
  0x40   : > { %s1938_s22 = scalar_select %p76_p12, %s1699_s17, %s78_s5  }
  0x41   : > { %s2402_s27 = scalar_select %p1931_p8, 1, 0 }
  0x42   : > { %p1942_p11 = por %p85_p0, %p2403_p10  ;;  %p1946_p13 = por %p91_p9, %p64_p6 }
  0x43   : > { %p143_p3 = scmp.eq.s32.totalorder %s1191_s4, 3  ;;  %p148_p4 = scmp.ne.s32.totalorder %s1683_s13, %s1679_s12 }
  0x44   : > { %s2405_s29 = scalar_select %p1946_p13, 1, 0 }
  0x45   : > { %p149_p2 = scmp.eq.s32.totalorder %s1192_s8, 3  ;;  %p1954_p7 = por %p143_p3, %p142_p1 }
  0x46   : > { %s201_s15 = sand.u32 1, %s1699_s17   ;;  %s1219_s6 = sshll.u32 %s1723_s23, 14 }
  0x47   : > { %s2406_s18 = scalar_select %p1954_p7, 1, 0 }
  0x48   : > { %p1959_p12 = por %p149_p2, %p148_p4  ;;  %s1201_s11 = sshll.u32 %s201_s15, 10 }
  0x49   : > { %s1967_s26 = scalar_lea.hbm %s2381_s1, %s1219_s6  ;;  %s205_s30 = scalar_lea.vmem [#allocation6], %s1201_s11 }
  0x4a   : > { %s2407_s3 = scalar_select %p1959_p12, 1, 0 }
  0x4b   : > { %s215_s4 = sshll.u32 %s205_s30, 4  ;;  %p2408_p6 = scmp.lt.s32.totalorder %s1731_s25, 4  ;;  %s1977_s4 = int_to_ptr.vmem [resolvable:$true] %s215_s4 }
  0x4c   : > { %s1979_s5 = scalar_lea.sflag [#allocation7], %s201_s15  ;;  %s1551_s6 = scalar_lea.hbm %s1967_s26, 16384 }
  0x4d   : > { %p1973_p0 = pnand %p2408_p6, %p1942_p11  ;;  %p1552_p9 = scmp.ne.s32.totalorder %s1967_s26, %s1551_s6 }
  0x4e   : > { %s1556_s7 = scalar_lea.hbm %s2381_s1, 32768  ;;  %p1557_p11 = scmp.lt.u32.totalorder %s1967_s26, %s2381_s1 }
  0x4f   : > { %p1553_p10 = pneg %p1973_p0  ;;  %p1558_p4 = scmp.lt.u32.totalorder %s1556_s7, %s1551_s6 }
  0x50   : > { %p1560_p6 = scmp.lt.u32.totalorder %s1551_s6, %s1967_s26 }
  0x51   : > { %p1554_p1 = pnand %p1553_p10, %p1552_p9  ;;  %p1559_p2 = por %p1558_p4, %p1557_p11 }
  0x53   : > { %p1555_p3 = pneg %p1554_p1  ;;  %p1561_p12 = por %p1560_p6, %p1559_p2 }
  0x55   : > { %p1562_p7 = pnand %p1561_p12, %p1555_p3 }
  0x57   : > { %1565 = shalt.err (!%p1562_p7)
}
  0x58   : > { %s1566_s15 = scalar_lea.vmem %s1977_s4, 16384  ;;  %s1737_s28 = smov [#allocation6]  }
  0x59   : > { %p1567_p9 = scmp.ne.s32.totalorder %s1977_s4, %s1566_s15  ;;  %s1571_s11 = sshll.u32 %s1737_s28, 4  ;;  %s1572_s11 = int_to_ptr.vmem [resolvable:$false] %s1571_s11 }
  0x5a   : > { %s1573_s2 = scalar_lea.vmem %s1572_s11, 32768  ;;  %p1574_p8 = scmp.lt.s32.totalorder %s1977_s4, %s1572_s11 }
  0x5b   : > { %p1569_p1 = pnand %p1567_p9, %p1553_p10  ;;  %p1575_p11 = scmp.lt.s32.totalorder %s1573_s2, %s1566_s15 }
  0x5d   : > { %p1570_p13 = pneg %p1569_p1  ;;  %p1576_p4 = por %p1575_p11, %p1574_p8 }
  0x5f   : > { %p1577_p2 = pnand %p1576_p4, %p1570_p13 }
  0x61   : > { %1580 = shalt.err (!%p1577_p2)
}
  0x62   : > { %s1738_s6 = smov 256   ;;  %s1739_s7 = smov 16  }
  0x63   : > { %1394 = dma.hbm_to_vmem [thread:$0]  (!%p1973_p0), %s1967_s26, 16384, %s1977_s4, %s1979_s5, %s1738_s6, %s1738_s6, %s1739_s7  }
  0x64   : > { %227 = sbr.rel (%p1918_p5) target bundleno = 520 (0x208), region = 32  ;;  %s229_s30 = sand.u32 (!%p1918_p5), 1, %s1707_s19  }
  0x65   : > { %s1206_s28 = sshll.u32 (!%p1918_p5), %s229_s30, 9  ;;  %s230_s11 = scalar_lea.sflag (!%p1918_p5), [#allocation4], %s229_s30 }
  0x66   : > { %s2010_s15 = scalar_lea.vmem (!%p1918_p5), [#allocation3], %s1206_s28  ;;  %p2410_p8 = scmp.ne.s32.totalorder (!%p1918_p5), %s2402_s27, 0 }
  0x6b   : > { %1666 = dma.done.wait (%p2410_p8), %s230_s11, 8192  }
  0x6c   : > { %1668 = vsyncadd (%p2410_p8), %s230_s11, 4294959104  ;;  %s238_s2 = sand.u32 1, %s1695_s16   ;;  %p2411_p5 = scmp.ne.s32.totalorder %s2405_s29, 0 }
  0x6d   : > { %s1207_s8 = sshll.u32 %s238_s2, 10  ;;  %s239_s26 = scalar_lea.sflag [#allocation7], %s238_s2 }
  0x6e   : > { %s2017_s4 = scalar_lea.vmem [#allocation6], %s1207_s8 }
  0x6f   : > { %1670 = dma.done.wait (%p2411_p5), %s239_s26, 16384  }
  0x70   : > { %1672 = vsyncadd (%p2411_p5), %s239_s26, 4294950912  ;;  %s271_s21 = sand.u32 1, %s1683_s13   ;;  %s2412_s27 = sld [smem:[#allocation12_spill]] }
  0x71   : > { %s1208_s5 = sshll.u32 %s271_s21, 8 }
  0x72   : > { %s2026_s6 = scalar_lea.vmem [#allocation8], %s1208_s5 }
  0x76   : > { %p1209_p13 = scmp.ne.s32.totalorder %s2412_s27, 0 }
  0x77   : > { %v1740_v0 = vmov (!%p1209_p13), 0.0  }
  0x78   : > { %288 = sbr.rel (%p1209_p13) target bundleno = 136 (0x88), region = 44  ;;  %289 = vst [vmem:[#allocation2] sm:$0xff] (!%p1209_p13), %v1740_v0  ;;  %290 = vst [vmem:[#allocation2 + $0x8] sm:$0xff] (!%p1209_p13), %v1740_v0 }
  0x79   : > { %291 = vst [vmem:[#allocation2 + $0x10] sm:$0xff] (!%p1209_p13), %v1740_v0  ;;  %292 = vst [vmem:[#allocation2 + $0x18] sm:$0xff] (!%p1209_p13), %v1740_v0 }
  0x7a   : > { %293 = vst [vmem:[#allocation2 + $0x20] sm:$0xff] (!%p1209_p13), %v1740_v0  ;;  %294 = vst [vmem:[#allocation2 + $0x28] sm:$0xff] (!%p1209_p13), %v1740_v0 }
  0x7b   : > { %295 = vst [vmem:[#allocation2 + $0x30] sm:$0xff] (!%p1209_p13), %v1740_v0  ;;  %296 = vst [vmem:[#allocation2 + $0x38] sm:$0xff] (!%p1209_p13), %v1740_v0 }
  0x7c   : > { %297 = vst [vmem:[#allocation2 + $0x40] sm:$0xff] (!%p1209_p13), %v1740_v0  ;;  %298 = vst [vmem:[#allocation2 + $0x48] sm:$0xff] (!%p1209_p13), %v1740_v0 }
  0x7d   : > { %299 = vst [vmem:[#allocation2 + $0x50] sm:$0xff] (!%p1209_p13), %v1740_v0  ;;  %300 = vst [vmem:[#allocation2 + $0x58] sm:$0xff] (!%p1209_p13), %v1740_v0 }
  0x7e   : > { %301 = vst [vmem:[#allocation2 + $0x60] sm:$0xff] (!%p1209_p13), %v1740_v0  ;;  %302 = vst [vmem:[#allocation2 + $0x68] sm:$0xff] (!%p1209_p13), %v1740_v0 }
  0x7f   : > { %303 = vst [vmem:[#allocation2 + $0x70] sm:$0xff] %v1740_v0  ;;  %304 = vst [vmem:[#allocation2 + $0x78] sm:$0xff] %v1740_v0 }
  0x80   : > { %305 = vst [vmem:[#allocation2 + $0x80] sm:$0xff] %v1740_v0  ;;  %306 = vst [vmem:[#allocation2 + $0x88] sm:$0xff] %v1740_v0 }
  0x81   : > { %307 = vst [vmem:[#allocation2 + $0x90] sm:$0xff] %v1740_v0  ;;  %308 = vst [vmem:[#allocation2 + $0x98] sm:$0xff] %v1740_v0 }
  0x82   : > { %309 = vst [vmem:[#allocation2 + $0xa0] sm:$0xff] %v1740_v0  ;;  %310 = vst [vmem:[#allocation2 + $0xa8] sm:$0xff] %v1740_v0 }
  0x83   : > { %311 = vst [vmem:[#allocation2 + $0xb0] sm:$0xff] %v1740_v0  ;;  %312 = vst [vmem:[#allocation2 + $0xb8] sm:$0xff] %v1740_v0 }
  0x84   : > { %313 = vst [vmem:[#allocation2 + $0xc0] sm:$0xff] %v1740_v0  ;;  %314 = vst [vmem:[#allocation2 + $0xc8] sm:$0xff] %v1740_v0 }
  0x85   : > { %315 = vst [vmem:[#allocation2 + $0xd0] sm:$0xff] %v1740_v0  ;;  %316 = vst [vmem:[#allocation2 + $0xd8] sm:$0xff] %v1740_v0 }
  0x86   : > { %317 = vst [vmem:[#allocation2 + $0xe0] sm:$0xff] %v1740_v0  ;;  %318 = vst [vmem:[#allocation2 + $0xe8] sm:$0xff] %v1740_v0 }
  0x87   : > { %319 = vst [vmem:[#allocation2 + $0xf0] sm:$0xff] %v1740_v0  ;;  %320 = vst [vmem:[#allocation2 + $0xf8] sm:$0xff] %v1740_v0 }
  0x88 PF: > { %v418_v1 = vld [vmem:[%s2017_s4 + $0x8] sm:$0xff]  ;;  %v420_v2 = vld [vmem:[%s2017_s4 + $0x18] sm:$0xff]  ;;  %v417_v6 = vld [vmem:[%s2017_s4] sm:$0xff]  ;;  %s2413_s29 = sld [smem:[#allocation12_spill]] }
  0x89   : > { %v482_v3 = vld [vmem:[%s2017_s4 + $0x208] sm:$0xff]  ;;  %v1222_v4 = vpack.c.bf16 %v420_v2, %v418_v1  ;;  %v484_v5 = vld [vmem:[%s2017_s4 + $0x218] sm:$0xff]  ;;  %v419_v7 = vld [vmem:[%s2017_s4 + $0x10] sm:$0xff] }
  0x8a   : > { %v1286_v8 = vpack.c.bf16 %v484_v5, %v482_v3  ;;  %v1224_v9 = vpack.c.bf16 %v419_v7, %v417_v6  ;;  %v481_v10 = vld [vmem:[%s2017_s4 + $0x200] sm:$0xff]  ;;  %v483_v11 = vld [vmem:[%s2017_s4 + $0x210] sm:$0xff]  ;;  %v422_v12 = vld [vmem:[%s2017_s4 + $0x28] sm:$0xff] }
  0x8b   : > { %1223 = vmatprep.subr.bf16.mxu1 %v1222_v4  ;;  %v1288_v13 = vpack.c.bf16 %v483_v11, %v481_v10  ;;  %v424_v14 = vld [vmem:[%s2017_s4 + $0x38] sm:$0xff]  ;;  %v486_v15 = vld [vmem:[%s2017_s4 + $0x228] sm:$0xff]  ;;  %v421_v19 = vld [vmem:[%s2017_s4 + $0x20] sm:$0xff] }
  0x8c   : > { %v488_v16 = vld [vmem:[%s2017_s4 + $0x238] sm:$0xff]  ;;  %1287 = vmatprep.subr.bf16.mxu0 %v1286_v8  ;;  %1225 = vmatpush1.bf16.msra.mxu1 %v1224_v9  ;;  %v1226_v17 = vpack.c.bf16 %v424_v14, %v422_v12  ;;  %v423_v20 = vld [vmem:[%s2017_s4 + $0x30] sm:$0xff]  ;;  %v485_v21 = vld [vmem:[%s2017_s4 + $0x220] sm:$0xff] }
  0x8d   : > { %v1290_v18 = vpack.c.bf16 %v488_v16, %v486_v15  ;;  %1289 = vmatpush1.bf16.msra.mxu0 %v1288_v13  ;;  %v1228_v22 = vpack.c.bf16 %v423_v20, %v421_v19  ;;  %v487_v23 = vld [vmem:[%s2017_s4 + $0x230] sm:$0xff]  ;;  %v426_v24 = vld [vmem:[%s2017_s4 + $0x48] sm:$0xff]  ;;  %v428_v25 = vld [vmem:[%s2017_s4 + $0x58] sm:$0xff] }
  0x8e   : > { %1227 = vmatprep.subr.bf16.mxu1 %v1226_v17  ;;  %v1292_v26 = vpack.c.bf16 %v487_v23, %v485_v21  ;;  %v1230_v27 = vpack.c.bf16 %v428_v25, %v426_v24  ;;  %v490_v28 = vld [vmem:[%s2017_s4 + $0x248] sm:$0xff]  ;;  %v492_v29 = vld [vmem:[%s2017_s4 + $0x258] sm:$0xff]  ;;  %v425_v30 = vld [vmem:[%s2017_s4 + $0x40] sm:$0xff]  ;;  %p1210_p7 = scmp.ne.s32.totalorder %s2413_s29, 1 }
  0x8f   : > { %1291 = vmatprep.subr.bf16.mxu0 %v1290_v18  ;;  %v1294_v31 = vpack.c.bf16 %v492_v29, %v490_v28  ;;  %v427_v32 = vld [vmem:[%s2017_s4 + $0x50] sm:$0xff]  ;;  %v489_v33 = vld [vmem:[%s2017_s4 + $0x240] sm:$0xff]  ;;  %v430_v36 = vld [vmem:[%s2017_s4 + $0x68] sm:$0xff]  ;;  %s2414_s28 = sld [smem:[#allocation16_spill]] (!%p1210_p7) }
  0x90   : > { %v491_v34 = vld [vmem:[%s2017_s4 + $0x250] sm:$0xff]  ;;  %1229 = vmatpush1.bf16.msra.mxu1 %v1228_v22  ;;  %v1232_v35 = vpack.c.bf16 %v427_v32, %v425_v30  ;;  %v432_v37 = vld [vmem:[%s2017_s4 + $0x78] sm:$0xff]  ;;  %v494_v38 = vld [vmem:[%s2017_s4 + $0x268] sm:$0xff] }
  0x91   : > { %1293 = vmatpush1.bf16.msra.mxu0 %v1292_v26  ;;  %1231 = vmatprep.subr.bf16.mxu1 %v1230_v27  ;;  %v1296_v39 = vpack.c.bf16 %v491_v34, %v489_v33  ;;  %v1234_v40 = vpack.c.bf16 %v432_v37, %v430_v36  ;;  %v496_v41 = vld [vmem:[%s2017_s4 + $0x278] sm:$0xff]  ;;  %v429_v42 = vld [vmem:[%s2017_s4 + $0x60] sm:$0xff]  ;;  %v431_v43 = vld [vmem:[%s2017_s4 + $0x70] sm:$0xff] }
  0x92   : > { %1295 = vmatprep.subr.bf16.mxu0 %v1294_v31  ;;  %v1298_v44 = vpack.c.bf16 %v496_v41, %v494_v38  ;;  %v493_v45 = vld [vmem:[%s2017_s4 + $0x260] sm:$0xff]  ;;  %v495_v46 = vld [vmem:[%s2017_s4 + $0x270] sm:$0xff]  ;;  %v434_v47 = vld [vmem:[%s2017_s4 + $0x88] sm:$0xff]  ;;  %v1236_v51 = vpack.c.bf16 %v431_v43, %v429_v42 }
  0x93   : > { %v436_v48 = vld [vmem:[%s2017_s4 + $0x98] sm:$0xff]  ;;  %v498_v49 = vld [vmem:[%s2017_s4 + $0x288] sm:$0xff]  ;;  %v1300_v52 = vpack.c.bf16 %v495_v46, %v493_v45  ;;  %v433_v54 = vld [vmem:[%s2017_s4 + $0x80] sm:$0xff] }
  0x94   : > { %v500_v50 = vld [vmem:[%s2017_s4 + $0x298] sm:$0xff]  ;;  %1233 = vmatpush1.bf16.msra.mxu1 %v1232_v35  ;;  %v1238_v53 = vpack.c.bf16 %v436_v48, %v434_v47  ;;  %v435_v55 = vld [vmem:[%s2017_s4 + $0x90] sm:$0xff]  ;;  %v497_v56 = vld [vmem:[%s2017_s4 + $0x280] sm:$0xff] }
  0x95   : > { %1297 = vmatpush1.bf16.msra.mxu0 %v1296_v39  ;;  %1235 = vmatprep.subr.bf16.mxu1 %v1234_v40  ;;  %v1302_v57 = vpack.c.bf16 %v500_v50, %v498_v49  ;;  %v499_v58 = vld [vmem:[%s2017_s4 + $0x290] sm:$0xff]  ;;  %v438_v59 = vld [vmem:[%s2017_s4 + $0xa8] sm:$0xff]  ;;  %v440_v60 = vld [vmem:[%s2017_s4 + $0xb8] sm:$0xff]  ;;  %v1240_v63 = vpack.c.bf16 %v435_v55, %v433_v54 }
  0x96   : > { %1299 = vmatprep.subr.bf16.mxu0 %v1298_v44  ;;  %v502_v61 = vld [vmem:[%s2017_s4 + $0x2a8] sm:$0xff]  ;;  %v504_v62 = vld [vmem:[%s2017_s4 + $0x2b8] sm:$0xff]  ;;  %v1304_v0 = vpack.c.bf16 %v499_v58, %v497_v56  ;;  %v1242_v1 = vpack.c.bf16 %v440_v60, %v438_v59  ;;  %v437_v2 = vld [vmem:[%s2017_s4 + $0xa0] sm:$0xff] }
  0x97   : > { %v439_v3 = vld [vmem:[%s2017_s4 + $0xb0] sm:$0xff]  ;;  %v501_v4 = vld [vmem:[%s2017_s4 + $0x2a0] sm:$0xff]  ;;  %v1306_v5 = vpack.c.bf16 %v504_v62, %v502_v61  ;;  %v442_v7 = vld [vmem:[%s2017_s4 + $0xc8] sm:$0xff] }
  0x98   : > { %1237 = vmatpush1.bf16.msra.mxu1 %v1236_v51  ;;  %v503_v6 = vld [vmem:[%s2017_s4 + $0x2b0] sm:$0xff]  ;;  %v444_v8 = vld [vmem:[%s2017_s4 + $0xd8] sm:$0xff]  ;;  %v506_v9 = vld [vmem:[%s2017_s4 + $0x2c8] sm:$0xff]  ;;  %v1244_v11 = vpack.c.bf16 %v439_v3, %v437_v2 }
  0x99   : > { %1301 = vmatpush1.bf16.msra.mxu0 %v1300_v52  ;;  %1239 = vmatprep.subr.bf16.mxu1 %v1238_v53  ;;  %v508_v10 = vld [vmem:[%s2017_s4 + $0x2d8] sm:$0xff]  ;;  %v1308_v12 = vpack.c.bf16 %v503_v6, %v501_v4  ;;  %v1246_v13 = vpack.c.bf16 %v444_v8, %v442_v7  ;;  %v441_v14 = vld [vmem:[%s2017_s4 + $0xc0] sm:$0xff]  ;;  %v443_v15 = vld [vmem:[%s2017_s4 + $0xd0] sm:$0xff] }
  0x9a   : > { %1303 = vmatprep.subr.bf16.mxu0 %v1302_v57  ;;  %v505_v16 = vld [vmem:[%s2017_s4 + $0x2c0] sm:$0xff]  ;;  %v1310_v17 = vpack.c.bf16 %v508_v10, %v506_v9  ;;  %v507_v18 = vld [vmem:[%s2017_s4 + $0x2d0] sm:$0xff]  ;;  %v446_v19 = vld [vmem:[%s2017_s4 + $0xe8] sm:$0xff]  ;;  %v1248_v23 = vpack.c.bf16 %v443_v15, %v441_v14 }
  0x9b   : > { %v448_v20 = vld [vmem:[%s2017_s4 + $0xf8] sm:$0xff]  ;;  %v510_v21 = vld [vmem:[%s2017_s4 + $0x2e8] sm:$0xff]  ;;  %v1312_v24 = vpack.c.bf16 %v507_v18, %v505_v16  ;;  %v445_v26 = vld [vmem:[%s2017_s4 + $0xe0] sm:$0xff] }
  0x9c   : > { %1241 = vmatpush1.bf16.msra.mxu1 %v1240_v63  ;;  %v512_v22 = vld [vmem:[%s2017_s4 + $0x2f8] sm:$0xff]  ;;  %v1250_v25 = vpack.c.bf16 %v448_v20, %v446_v19  ;;  %v447_v27 = vld [vmem:[%s2017_s4 + $0xf0] sm:$0xff]  ;;  %v509_v28 = vld [vmem:[%s2017_s4 + $0x2e0] sm:$0xff] }
  0x9d   : > { %1305 = vmatpush1.bf16.msra.mxu0 %v1304_v0  ;;  %1243 = vmatprep.subr.bf16.mxu1 %v1242_v1  ;;  %v1314_v29 = vpack.c.bf16 %v512_v22, %v510_v21  ;;  %v511_v30 = vld [vmem:[%s2017_s4 + $0x2f0] sm:$0xff]  ;;  %v450_v31 = vld [vmem:[%s2017_s4 + $0x108] sm:$0xff]  ;;  %v452_v32 = vld [vmem:[%s2017_s4 + $0x118] sm:$0xff]  ;;  %v1252_v35 = vpack.c.bf16 %v447_v27, %v445_v26 }
  0x9e   : > { %1307 = vmatprep.subr.bf16.mxu0 %v1306_v5  ;;  %v514_v33 = vld [vmem:[%s2017_s4 + $0x308] sm:$0xff]  ;;  %v516_v34 = vld [vmem:[%s2017_s4 + $0x318] sm:$0xff]  ;;  %v1316_v36 = vpack.c.bf16 %v511_v30, %v509_v28  ;;  %v1254_v37 = vpack.c.bf16 %v452_v32, %v450_v31  ;;  %v449_v38 = vld [vmem:[%s2017_s4 + $0x100] sm:$0xff] }
  0x9f   : > { %v451_v39 = vld [vmem:[%s2017_s4 + $0x110] sm:$0xff]  ;;  %v513_v40 = vld [vmem:[%s2017_s4 + $0x300] sm:$0xff]  ;;  %v1318_v41 = vpack.c.bf16 %v516_v34, %v514_v33  ;;  %v454_v43 = vld [vmem:[%s2017_s4 + $0x128] sm:$0xff] }
  0xa0   : > { %1245 = vmatpush1.bf16.msra.mxu1 %v1244_v11  ;;  %v515_v42 = vld [vmem:[%s2017_s4 + $0x310] sm:$0xff]  ;;  %v456_v44 = vld [vmem:[%s2017_s4 + $0x138] sm:$0xff]  ;;  %v518_v45 = vld [vmem:[%s2017_s4 + $0x328] sm:$0xff]  ;;  %v1256_v47 = vpack.c.bf16 %v451_v39, %v449_v38 }
  0xa1   : > { %1309 = vmatpush1.bf16.msra.mxu0 %v1308_v12  ;;  %1247 = vmatprep.subr.bf16.mxu1 %v1246_v13  ;;  %v520_v46 = vld [vmem:[%s2017_s4 + $0x338] sm:$0xff]  ;;  %v1320_v48 = vpack.c.bf16 %v515_v42, %v513_v40  ;;  %v1258_v49 = vpack.c.bf16 %v456_v44, %v454_v43  ;;  %v453_v50 = vld [vmem:[%s2017_s4 + $0x120] sm:$0xff]  ;;  %v455_v51 = vld [vmem:[%s2017_s4 + $0x130] sm:$0xff] }
  0xa2   : > { %1311 = vmatprep.subr.bf16.mxu0 %v1310_v17  ;;  %v517_v52 = vld [vmem:[%s2017_s4 + $0x320] sm:$0xff]  ;;  %v1322_v53 = vpack.c.bf16 %v520_v46, %v518_v45  ;;  %v519_v54 = vld [vmem:[%s2017_s4 + $0x330] sm:$0xff]  ;;  %v458_v55 = vld [vmem:[%s2017_s4 + $0x148] sm:$0xff]  ;;  %v1260_v59 = vpack.c.bf16 %v455_v51, %v453_v50 }
  0xa3   : > { %v460_v56 = vld [vmem:[%s2017_s4 + $0x158] sm:$0xff]  ;;  %v522_v57 = vld [vmem:[%s2017_s4 + $0x348] sm:$0xff]  ;;  %v1324_v60 = vpack.c.bf16 %v519_v54, %v517_v52  ;;  %v457_v62 = vld [vmem:[%s2017_s4 + $0x140] sm:$0xff] }
  0xa4   : > { %1249 = vmatpush1.bf16.msra.mxu1 %v1248_v23  ;;  %v524_v58 = vld [vmem:[%s2017_s4 + $0x358] sm:$0xff]  ;;  %v1262_v61 = vpack.c.bf16 %v460_v56, %v458_v55  ;;  %v459_v63 = vld [vmem:[%s2017_s4 + $0x150] sm:$0xff]  ;;  %v521_v0 = vld [vmem:[%s2017_s4 + $0x340] sm:$0xff] }
  0xa5   : > { %1313 = vmatpush1.bf16.msra.mxu0 %v1312_v24  ;;  %1251 = vmatprep.subr.bf16.mxu1 %v1250_v25  ;;  %v1326_v1 = vpack.c.bf16 %v524_v58, %v522_v57  ;;  %v523_v2 = vld [vmem:[%s2017_s4 + $0x350] sm:$0xff]  ;;  %v462_v3 = vld [vmem:[%s2017_s4 + $0x168] sm:$0xff]  ;;  %v464_v4 = vld [vmem:[%s2017_s4 + $0x178] sm:$0xff]  ;;  %v1264_v7 = vpack.c.bf16 %v459_v63, %v457_v62 }
  0xa6   : > { %1315 = vmatprep.subr.bf16.mxu0 %v1314_v29  ;;  %v526_v5 = vld [vmem:[%s2017_s4 + $0x368] sm:$0xff]  ;;  %v528_v6 = vld [vmem:[%s2017_s4 + $0x378] sm:$0xff]  ;;  %v461_v8 = vld [vmem:[%s2017_s4 + $0x160] sm:$0xff]  ;;  %v1328_v9 = vpack.c.bf16 %v523_v2, %v521_v0  ;;  %v1266_v10 = vpack.c.bf16 %v464_v4, %v462_v3 }
  0xa7   : > { %v463_v11 = vld [vmem:[%s2017_s4 + $0x170] sm:$0xff]  ;;  %v525_v12 = vld [vmem:[%s2017_s4 + $0x360] sm:$0xff]  ;;  %v1330_v14 = vpack.c.bf16 %v528_v6, %v526_v5  ;;  %v466_v15 = vld [vmem:[%s2017_s4 + $0x188] sm:$0xff] }
  0xa8   : > { %1253 = vmatpush1.bf16.msra.mxu1 %v1252_v35  ;;  %v527_v13 = vld [vmem:[%s2017_s4 + $0x370] sm:$0xff]  ;;  %v468_v16 = vld [vmem:[%s2017_s4 + $0x198] sm:$0xff]  ;;  %v354_v17 = vld [vmem:[%s2010_s15 + $0x8] sm:$0xff]  ;;  %v1268_v21 = vpack.c.bf16 %v463_v11, %v461_v8 }
  0xa9   : > { %1317 = vmatpush1.bf16.msra.mxu0 %v1316_v36  ;;  %1255 = vmatprep.subr.bf16.mxu1 %v1254_v37  ;;  %v530_v18 = vld [vmem:[%s2017_s4 + $0x388] sm:$0xff]  ;;  %v532_v19 = vld [vmem:[%s2017_s4 + $0x398] sm:$0xff]  ;;  %v1332_v22 = vpack.c.bf16 %v527_v13, %v525_v12  ;;  %v1270_v23 = vpack.c.bf16 %v468_v16, %v466_v15  ;;  %v465_v24 = vld [vmem:[%s2017_s4 + $0x180] sm:$0xff] }
  0xaa   : > { %1319 = vmatprep.subr.bf16.mxu0 %v1318_v41  ;;  %609 = vmatprep.mubr.f32.mxu1 %v354_v17  ;;  %v356_v20 = vld [vmem:[%s2010_s15 + $0x18] sm:$0xff]  ;;  %v467_v25 = vld [vmem:[%s2017_s4 + $0x190] sm:$0xff]  ;;  %v529_v26 = vld [vmem:[%s2017_s4 + $0x380] sm:$0xff]  ;;  %v1334_v27 = vpack.c.bf16 %v532_v19, %v530_v18 }
  0xab   : > { %770 = vmatprep.mubr.f32.mxu0 %v356_v20  ;;  %v531_v28 = vld [vmem:[%s2017_s4 + $0x390] sm:$0xff]  ;;  %v470_v29 = vld [vmem:[%s2017_s4 + $0x1a8] sm:$0xff]  ;;  %v472_v30 = vld [vmem:[%s2017_s4 + $0x1b8] sm:$0xff]  ;;  %v1272_v33 = vpack.c.bf16 %v467_v25, %v465_v24 }
  0xac   : > { %1257 = vmatpush1.bf16.msra.mxu1 %v1256_v47  ;;  %v534_v31 = vld [vmem:[%s2017_s4 + $0x3a8] sm:$0xff]  ;;  %v536_v32 = vld [vmem:[%s2017_s4 + $0x3b8] sm:$0xff]  ;;  %v1336_v34 = vpack.c.bf16 %v531_v28, %v529_v26  ;;  %v1274_v35 = vpack.c.bf16 %v472_v30, %v470_v29  ;;  %v469_v36 = vld [vmem:[%s2017_s4 + $0x1a0] sm:$0xff] }
  0xad   : > { %1321 = vmatpush1.bf16.msra.mxu0 %v1320_v48  ;;  %1259 = vmatprep.subr.bf16.mxu1 %v1258_v49  ;;  %v471_v37 = vld [vmem:[%s2017_s4 + $0x1b0] sm:$0xff]  ;;  %v533_v38 = vld [vmem:[%s2017_s4 + $0x3a0] sm:$0xff]  ;;  %v1338_v39 = vpack.c.bf16 %v536_v32, %v534_v31  ;;  %v474_v41 = vld [vmem:[%s2017_s4 + $0x1c8] sm:$0xff] }
  0xae   : > { %1323 = vmatprep.subr.bf16.mxu0 %v1322_v53  ;;  %v535_v40 = vld [vmem:[%s2017_s4 + $0x3b0] sm:$0xff]  ;;  %v476_v42 = vld [vmem:[%s2017_s4 + $0x1d8] sm:$0xff]  ;;  %v538_v43 = vld [vmem:[%s2017_s4 + $0x3c8] sm:$0xff]  ;;  %v1276_v45 = vpack.c.bf16 %v471_v37, %v469_v36 }
  0xaf   : > { %v540_v44 = vld [vmem:[%s2017_s4 + $0x3d8] sm:$0xff]  ;;  %v1340_v46 = vpack.c.bf16 %v535_v40, %v533_v38  ;;  %v1278_v47 = vpack.c.bf16 %v476_v42, %v474_v41  ;;  %v473_v48 = vld [vmem:[%s2017_s4 + $0x1c0] sm:$0xff]  ;;  %v475_v49 = vld [vmem:[%s2017_s4 + $0x1d0] sm:$0xff] }
  0xb0   : > { %1261 = vmatpush1.bf16.msra.mxu1 %v1260_v59  ;;  %v537_v50 = vld [vmem:[%s2017_s4 + $0x3c0] sm:$0xff]  ;;  %v1342_v51 = vpack.c.bf16 %v540_v44, %v538_v43  ;;  %v539_v52 = vld [vmem:[%s2017_s4 + $0x3d0] sm:$0xff]  ;;  %v478_v53 = vld [vmem:[%s2017_s4 + $0x1e8] sm:$0xff]  ;;  %v1280_v57 = vpack.c.bf16 %v475_v49, %v473_v48 }
  0xb1   : > { %1325 = vmatpush1.bf16.msra.mxu0 %v1324_v60  ;;  %1263 = vmatprep.subr.bf16.mxu1 %v1262_v61  ;;  %v480_v54 = vld [vmem:[%s2017_s4 + $0x1f8] sm:$0xff]  ;;  %v542_v55 = vld [vmem:[%s2017_s4 + $0x3e8] sm:$0xff]  ;;  %v1344_v58 = vpack.c.bf16 %v539_v52, %v537_v50  ;;  %v477_v60 = vld [vmem:[%s2017_s4 + $0x1e0] sm:$0xff] }
  0xb2   : > { %1327 = vmatprep.subr.bf16.mxu0 %v1326_v1  ;;  %v544_v56 = vld [vmem:[%s2017_s4 + $0x3f8] sm:$0xff]  ;;  %v1282_v59 = vpack.c.bf16 %v480_v54, %v478_v53  ;;  %v479_v61 = vld [vmem:[%s2017_s4 + $0x1f0] sm:$0xff]  ;;  %v541_v63 = vld [vmem:[%s2017_s4 + $0x3e0] sm:$0xff] }
  0xb3   : > { %v1346_v62 = vpack.c.bf16 %v544_v56, %v542_v55  ;;  %v543_v0 = vld [vmem:[%s2017_s4 + $0x3f0] sm:$0xff]  ;;  %v1284_v1 = vpack.c.bf16 %v479_v61, %v477_v60  ;;  %v353_v3 = vld [vmem:[%s2010_s15] sm:$0xff]  ;;  %v358_v5 = vld [vmem:[%s2010_s15 + $0x28] sm:$0xff] }
  0xb4   : > { %1265 = vmatpush1.bf16.msra.mxu1 %v1264_v7  ;;  %v1348_v2 = vpack.c.bf16 %v543_v0, %v541_v63  ;;  %v355_v4 = vld [vmem:[%s2010_s15 + $0x10] sm:$0xff]  ;;  %v360_v6 = vld [vmem:[%s2010_s15 + $0x38] sm:$0xff]  ;;  %v357_v7 = vld [vmem:[%s2010_s15 + $0x20] sm:$0xff] }
  0xb5   : > { %1329 = vmatpush1.bf16.msra.mxu0 %v1328_v9  ;;  %1267 = vmatprep.subr.bf16.mxu1 %v1266_v10  ;;  %v359_v8 = vld [vmem:[%s2010_s15 + $0x30] sm:$0xff]  ;;  %v362_v9 = vld [vmem:[%s2010_s15 + $0x48] sm:$0xff]  ;;  %v364_v10 = vld [vmem:[%s2010_s15 + $0x58] sm:$0xff] }
  0xb6   : > { %1331 = vmatprep.subr.bf16.mxu0 %v1330_v14  ;;  %v361_v11 = vld [vmem:[%s2010_s15 + $0x40] sm:$0xff]  ;;  %v363_v12 = vld [vmem:[%s2010_s15 + $0x50] sm:$0xff]  ;;  %v366_v13 = vld [vmem:[%s2010_s15 + $0x68] sm:$0xff] }
  0xb7   : > { %v368_v14 = vld [vmem:[%s2010_s15 + $0x78] sm:$0xff]  ;;  %v365_v15 = vld [vmem:[%s2010_s15 + $0x60] sm:$0xff]  ;;  %v367_v16 = vld [vmem:[%s2010_s15 + $0x70] sm:$0xff] }
  0xb8   : > { %1269 = vmatpush1.bf16.msra.mxu1 %v1268_v21  ;;  %v370_v17 = vld [vmem:[%s2010_s15 + $0x88] sm:$0xff]  ;;  %v372_v18 = vld [vmem:[%s2010_s15 + $0x98] sm:$0xff]  ;;  %v369_v19 = vld [vmem:[%s2010_s15 + $0x80] sm:$0xff] }
  0xb9   : > { %1333 = vmatpush1.bf16.msra.mxu0 %v1332_v22  ;;  %1271 = vmatprep.subr.bf16.mxu1 %v1270_v23  ;;  %v371_v20 = vld [vmem:[%s2010_s15 + $0x90] sm:$0xff]  ;;  %v374_v21 = vld [vmem:[%s2010_s15 + $0xa8] sm:$0xff]  ;;  %v376_v22 = vld [vmem:[%s2010_s15 + $0xb8] sm:$0xff] }
  0xba   : > { %1335 = vmatprep.subr.bf16.mxu0 %v1334_v27  ;;  %v373_v23 = vld [vmem:[%s2010_s15 + $0xa0] sm:$0xff]  ;;  %v375_v24 = vld [vmem:[%s2010_s15 + $0xb0] sm:$0xff]  ;;  %v378_v25 = vld [vmem:[%s2010_s15 + $0xc8] sm:$0xff] }
  0xbb   : > { %v380_v26 = vld [vmem:[%s2010_s15 + $0xd8] sm:$0xff]  ;;  %v377_v27 = vld [vmem:[%s2010_s15 + $0xc0] sm:$0xff]  ;;  %v379_v28 = vld [vmem:[%s2010_s15 + $0xd0] sm:$0xff] }
  0xbc   : > { %1273 = vmatpush1.bf16.msra.mxu1 %v1272_v33  ;;  %v382_v29 = vld [vmem:[%s2010_s15 + $0xe8] sm:$0xff]  ;;  %v384_v30 = vld [vmem:[%s2010_s15 + $0xf8] sm:$0xff]  ;;  %v381_v31 = vld [vmem:[%s2010_s15 + $0xe0] sm:$0xff] }
  0xbd   : > { %1337 = vmatpush1.bf16.msra.mxu0 %v1336_v34  ;;  %1275 = vmatprep.subr.bf16.mxu1 %v1274_v35  ;;  %v383_v32 = vld [vmem:[%s2010_s15 + $0xf0] sm:$0xff]  ;;  %v386_v33 = vld [vmem:[%s2010_s15 + $0x108] sm:$0xff]  ;;  %v388_v34 = vld [vmem:[%s2010_s15 + $0x118] sm:$0xff] }
  0xbe   : > { %1339 = vmatprep.subr.bf16.mxu0 %v1338_v39  ;;  %v385_v35 = vld [vmem:[%s2010_s15 + $0x100] sm:$0xff]  ;;  %v387_v36 = vld [vmem:[%s2010_s15 + $0x110] sm:$0xff]  ;;  %v390_v37 = vld [vmem:[%s2010_s15 + $0x128] sm:$0xff] }
  0xbf   : > { %v392_v38 = vld [vmem:[%s2010_s15 + $0x138] sm:$0xff]  ;;  %v389_v39 = vld [vmem:[%s2010_s15 + $0x120] sm:$0xff]  ;;  %v391_v40 = vld [vmem:[%s2010_s15 + $0x130] sm:$0xff] }
  0xc0   : > { %1277 = vmatpush1.bf16.msra.mxu1 %v1276_v45  ;;  %v394_v41 = vld [vmem:[%s2010_s15 + $0x148] sm:$0xff]  ;;  %v396_v42 = vld [vmem:[%s2010_s15 + $0x158] sm:$0xff]  ;;  %v393_v43 = vld [vmem:[%s2010_s15 + $0x140] sm:$0xff] }
  0xc1   : > { %1341 = vmatpush1.bf16.msra.mxu0 %v1340_v46  ;;  %1279 = vmatprep.subr.bf16.mxu1 %v1278_v47  ;;  %v395_v44 = vld [vmem:[%s2010_s15 + $0x150] sm:$0xff]  ;;  %v398_v45 = vld [vmem:[%s2010_s15 + $0x168] sm:$0xff]  ;;  %v400_v46 = vld [vmem:[%s2010_s15 + $0x178] sm:$0xff] }
  0xc2   : > { %1343 = vmatprep.subr.bf16.mxu0 %v1342_v51  ;;  %v397_v47 = vld [vmem:[%s2010_s15 + $0x160] sm:$0xff]  ;;  %v399_v48 = vld [vmem:[%s2010_s15 + $0x170] sm:$0xff]  ;;  %v402_v49 = vld [vmem:[%s2010_s15 + $0x188] sm:$0xff] }
  0xc3   : > { %v404_v50 = vld [vmem:[%s2010_s15 + $0x198] sm:$0xff]  ;;  %v401_v51 = vld [vmem:[%s2010_s15 + $0x180] sm:$0xff]  ;;  %v403_v52 = vld [vmem:[%s2010_s15 + $0x190] sm:$0xff] }
  0xc4   : > { %1281 = vmatpush1.bf16.msra.mxu1 %v1280_v57  ;;  %v406_v53 = vld [vmem:[%s2010_s15 + $0x1a8] sm:$0xff]  ;;  %v408_v54 = vld [vmem:[%s2010_s15 + $0x1b8] sm:$0xff]  ;;  %v405_v55 = vld [vmem:[%s2010_s15 + $0x1a0] sm:$0xff] }
  0xc5   : > { %1345 = vmatpush1.bf16.msra.mxu0 %v1344_v58  ;;  %1283 = vmatprep.subr.bf16.mxu1 %v1282_v59  ;;  %v407_v56 = vld [vmem:[%s2010_s15 + $0x1b0] sm:$0xff]  ;;  %v410_v57 = vld [vmem:[%s2010_s15 + $0x1c8] sm:$0xff]  ;;  %v412_v58 = vld [vmem:[%s2010_s15 + $0x1d8] sm:$0xff] }
  0xc6   : > { %1347 = vmatprep.subr.bf16.mxu0 %v1346_v62  ;;  %v409_v59 = vld [vmem:[%s2010_s15 + $0x1c0] sm:$0xff]  ;;  %v411_v60 = vld [vmem:[%s2010_s15 + $0x1d0] sm:$0xff]  ;;  %v414_v61 = vld [vmem:[%s2010_s15 + $0x1e8] sm:$0xff] }
  0xc7   : > { %v416_v62 = vld [vmem:[%s2010_s15 + $0x1f8] sm:$0xff]  ;;  %v413_v63 = vld [vmem:[%s2010_s15 + $0x1e0] sm:$0xff]  ;;  %v415_v0 = vld [vmem:[%s2010_s15 + $0x1f0] sm:$0xff] }
  0xc8   : > { %1285 = vmatpush1.bf16.msra.mxu1 %v1284_v1 }
  0xc9   : > { %1349 = vmatpush1.bf16.msra.mxu0 %v1348_v2  ;;  %v321_v2 = vld [vmem:[#allocation2] sm:$0xff] }
  0xcb   : > { %610 = vmatmul.mubr.f32.vlgmr.msra.gmra.mrb[0].mxu1 %v353_v3 }
  0xcc   : > { %771 = vmatmul.mubr.f32.vlgmr.msra.gmra.mrb[0].mxu0 %v355_v4  ;;  %615 = vmatprep.mubr.f32.mxu1 %v358_v5 }
  0xcd   : > { %776 = vmatprep.mubr.f32.mxu0 %v360_v6  ;;  %v322_v6 = vld [vmem:[#allocation2 + $0x8] sm:$0xff] }
  0xcf   : > { %616 = vmatmul.mubr.f32.gmra.mrb[2].mxu1 %v357_v7 }
  0xd0   : > { %777 = vmatmul.mubr.f32.gmra.mrb[2].mxu0 %v359_v8  ;;  %621 = vmatprep.mubr.f32.mxu1 %v362_v9 }
  0xd1   : > { %782 = vmatprep.mubr.f32.mxu0 %v364_v10 }
  0xd3   : > { %622 = vmatmul.mubr.f32.gmra.mrb[4].mxu1 %v361_v11 }
  0xd4   : > { %783 = vmatmul.mubr.f32.gmra.mrb[4].mxu0 %v363_v12  ;;  %627 = vmatprep.mubr.f32.mxu1 %v366_v13  ;;  %v323_v12 = vld [vmem:[#allocation2 + $0x10] sm:$0xff] }
  0xd5   : > { %788 = vmatprep.mubr.f32.mxu0 %v368_v14 }
  0xd7   : > { %628 = vmatmul.mubr.f32.gmra.mrb[6].mxu1 %v365_v15 }
  0xd8   : > { %789 = vmatmul.mubr.f32.gmra.mrb[6].mxu0 %v367_v16  ;;  %633 = vmatprep.mubr.f32.mxu1 %v370_v17  ;;  %v324_v16 = vld [vmem:[#allocation2 + $0x18] sm:$0xff] }
  0xd9   : > { %794 = vmatprep.mubr.f32.mxu0 %v372_v18 }
  0xdb   : > { %634 = vmatmul.mubr.f32.gmra.mrb[8].mxu1 %v369_v19 }
  0xdc   : > { %795 = vmatmul.mubr.f32.gmra.mrb[8].mxu0 %v371_v20  ;;  %639 = vmatprep.mubr.f32.mxu1 %v374_v21 }
  0xdd   : > { %800 = vmatprep.mubr.f32.mxu0 %v376_v22  ;;  %v325_v22 = vld [vmem:[#allocation2 + $0x20] sm:$0xff] }
  0xdf   : > { %640 = vmatmul.mubr.f32.gmra.mrb[10].mxu1 %v373_v23 }
  0xe0   : > { %801 = vmatmul.mubr.f32.gmra.mrb[10].mxu0 %v375_v24  ;;  %645 = vmatprep.mubr.f32.mxu1 %v378_v25 }
  0xe1   : > { %806 = vmatprep.mubr.f32.mxu0 %v380_v26  ;;  %v326_v26 = vld [vmem:[#allocation2 + $0x28] sm:$0xff] }
  0xe3   : > { %646 = vmatmul.mubr.f32.gmra.mrb[12].mxu1 %v377_v27 }
  0xe4   : > { %807 = vmatmul.mubr.f32.gmra.mrb[12].mxu0 %v379_v28  ;;  %651 = vmatprep.mubr.f32.mxu1 %v382_v29 }
  0xe5   : > { %812 = vmatprep.mubr.f32.mxu0 %v384_v30 }
  0xe7   : > { %652 = vmatmul.mubr.f32.gmra.mrb[14].mxu1 %v381_v31 }
  0xe8   : > { %813 = vmatmul.mubr.f32.gmra.mrb[14].mxu0 %v383_v32  ;;  %657 = vmatprep.mubr.f32.mxu1 %v386_v33  ;;  %v327_v32 = vld [vmem:[#allocation2 + $0x30] sm:$0xff] }
  0xe9   : > { %818 = vmatprep.mubr.f32.mxu0 %v388_v34 }
  0xeb   : > { %658 = vmatmul.mubr.f32.gmra.mrb[16].mxu1 %v385_v35 }
  0xec   : > { %819 = vmatmul.mubr.f32.gmra.mrb[16].mxu0 %v387_v36  ;;  %663 = vmatprep.mubr.f32.mxu1 %v390_v37  ;;  %v328_v36 = vld [vmem:[#allocation2 + $0x38] sm:$0xff] }
  0xed   : > { %824 = vmatprep.mubr.f32.mxu0 %v392_v38 }
  0xef   : > { %664 = vmatmul.mubr.f32.gmra.mrb[18].mxu1 %v389_v39 }
  0xf0   : > { %825 = vmatmul.mubr.f32.gmra.mrb[18].mxu0 %v391_v40  ;;  %669 = vmatprep.mubr.f32.mxu1 %v394_v41 }
  0xf1   : > { %830 = vmatprep.mubr.f32.mxu0 %v396_v42  ;;  %v329_v42 = vld [vmem:[#allocation2 + $0x40] sm:$0xff] }
  0xf3   : > { %670 = vmatmul.mubr.f32.gmra.mrb[20].mxu1 %v393_v43 }
  0xf4   : > { %831 = vmatmul.mubr.f32.gmra.mrb[20].mxu0 %v395_v44  ;;  %675 = vmatprep.mubr.f32.mxu1 %v398_v45 }
  0xf5   : > { %836 = vmatprep.mubr.f32.mxu0 %v400_v46  ;;  %v330_v46 = vld [vmem:[#allocation2 + $0x48] sm:$0xff] }
  0xf7   : > { %676 = vmatmul.mubr.f32.gmra.mrb[22].mxu1 %v397_v47 }
  0xf8   : > { %837 = vmatmul.mubr.f32.gmra.mrb[22].mxu0 %v399_v48  ;;  %681 = vmatprep.mubr.f32.mxu1 %v402_v49 }
  0xf9   : > { %842 = vmatprep.mubr.f32.mxu0 %v404_v50 }
  0xfb   : > { %682 = vmatmul.mubr.f32.gmra.mrb[24].mxu1 %v401_v51 }
  0xfc   : > { %843 = vmatmul.mubr.f32.gmra.mrb[24].mxu0 %v403_v52  ;;  %687 = vmatprep.mubr.f32.mxu1 %v406_v53  ;;  %v331_v52 = vld [vmem:[#allocation2 + $0x50] sm:$0xff] }
  0xfd   : > { %848 = vmatprep.mubr.f32.mxu0 %v408_v54 }
  0xff   : > { %688 = vmatmul.mubr.f32.gmra.mrb[26].mxu1 %v405_v55 }
 0x100   : > { %849 = vmatmul.mubr.f32.gmra.mrb[26].mxu0 %v407_v56  ;;  %693 = vmatprep.mubr.f32.mxu1 %v410_v57  ;;  %v332_v56 = vld [vmem:[#allocation2 + $0x58] sm:$0xff] }
 0x101   : > { %854 = vmatprep.mubr.f32.mxu0 %v412_v58 }
 0x103   : > { %694 = vmatmul.mubr.f32.gmra.mrb[28].mxu1 %v409_v59 }
 0x104   : > { %855 = vmatmul.mubr.f32.gmra.mrb[28].mxu0 %v411_v60  ;;  %699 = vmatprep.mubr.f32.mxu1 %v414_v61 }
 0x105   : > { %860 = vmatprep.mubr.f32.mxu0 %v416_v62  ;;  %v333_v62 = vld [vmem:[#allocation2 + $0x60] sm:$0xff] }
 0x107   : > { %700 = vmatmul.mubr.f32.gmra.mrb[30].mxu1 %v413_v63 }
 0x108   : > { %861 = vmatmul.mubr.f32.gmra.mrb[30].mxu0 %v415_v0 }
 0x19e   : > { %v611_v1 = vpop.f32.mrb[0].mxu1 }
 0x19f   : > { %v772_v3 = vpop.f32.mrb[0].mxu0  ;;  %v613_v4 = vpop.f32.mrb[1].mxu1 }
 0x1a0   : > { %v773_v5 = vadd.f32 %v772_v3, %v611_v1  ;;  %v774_v7 = vpop.f32.mrb[1].mxu0 }
 0x1a1   : > { %v775_v8 = vadd.f32 %v774_v7, %v613_v4 }
 0x1a2   : > { %v867_v9 = vadd.f32 %v773_v5, %v321_v2  ;;  %v617_v10 = vpop.f32.mrb[2].mxu1  ;;  %v334_v2 = vld [vmem:[#allocation2 + $0x68] sm:$0xff] }
 0x1a3   : > { %v868_v11 = vadd.f32 %v775_v8, %v322_v6  ;;  %v778_v13 = vpop.f32.mrb[2].mxu0  ;;  %v619_v14 = vpop.f32.mrb[3].mxu1  ;;  %v335_v8 = vld [vmem:[#allocation2 + $0x70] sm:$0xff] }
 0x1a4   : > { %899 = vst [vmem:[#allocation2] sm:$0xff] %v867_v9  ;;  %v779_v15 = vadd.f32 %v778_v13, %v617_v10  ;;  %v780_v17 = vpop.f32.mrb[3].mxu0 }
 0x1a5   : > { %900 = vst [vmem:[#allocation2 + $0x8] sm:$0xff] %v868_v11  ;;  %v781_v18 = vadd.f32 %v780_v17, %v619_v14 }
 0x1a6   : > { %v869_v19 = vadd.f32 %v779_v15, %v323_v12  ;;  %v623_v20 = vpop.f32.mrb[4].mxu1  ;;  %v336_v12 = vld [vmem:[#allocation2 + $0x78] sm:$0xff] }
 0x1a7   : > { %v870_v21 = vadd.f32 %v781_v18, %v324_v16  ;;  %v784_v23 = vpop.f32.mrb[4].mxu0  ;;  %v625_v24 = vpop.f32.mrb[5].mxu1  ;;  %v337_v18 = vld [vmem:[#allocation2 + $0x80] sm:$0xff] }
 0x1a8   : > { %901 = vst [vmem:[#allocation2 + $0x10] sm:$0xff] %v869_v19  ;;  %v785_v25 = vadd.f32 %v784_v23, %v623_v20  ;;  %v786_v27 = vpop.f32.mrb[5].mxu0 }
 0x1a9   : > { %902 = vst [vmem:[#allocation2 + $0x18] sm:$0xff] %v870_v21  ;;  %v787_v28 = vadd.f32 %v786_v27, %v625_v24 }
 0x1aa   : > { %v871_v29 = vadd.f32 %v785_v25, %v325_v22  ;;  %v629_v30 = vpop.f32.mrb[6].mxu1  ;;  %v338_v22 = vld [vmem:[#allocation2 + $0x88] sm:$0xff] }
 0x1ab   : > { %v872_v31 = vadd.f32 %v787_v28, %v326_v26  ;;  %v790_v33 = vpop.f32.mrb[6].mxu0  ;;  %v631_v34 = vpop.f32.mrb[7].mxu1  ;;  %v339_v28 = vld [vmem:[#allocation2 + $0x90] sm:$0xff] }
 0x1ac   : > { %903 = vst [vmem:[#allocation2 + $0x20] sm:$0xff] %v871_v29  ;;  %v791_v35 = vadd.f32 %v790_v33, %v629_v30  ;;  %v792_v37 = vpop.f32.mrb[7].mxu0 }
 0x1ad   : > { %904 = vst [vmem:[#allocation2 + $0x28] sm:$0xff] %v872_v31  ;;  %v793_v38 = vadd.f32 %v792_v37, %v631_v34 }
 0x1ae   : > { %v873_v39 = vadd.f32 %v791_v35, %v327_v32  ;;  %v635_v40 = vpop.f32.mrb[8].mxu1  ;;  %v340_v32 = vld [vmem:[#allocation2 + $0x98] sm:$0xff] }
 0x1af   : > { %v874_v41 = vadd.f32 %v793_v38, %v328_v36  ;;  %v796_v43 = vpop.f32.mrb[8].mxu0  ;;  %v637_v44 = vpop.f32.mrb[9].mxu1  ;;  %v341_v38 = vld [vmem:[#allocation2 + $0xa0] sm:$0xff] }
 0x1b0   : > { %905 = vst [vmem:[#allocation2 + $0x30] sm:$0xff] %v873_v39  ;;  %v797_v45 = vadd.f32 %v796_v43, %v635_v40  ;;  %v798_v47 = vpop.f32.mrb[9].mxu0 }
 0x1b1   : > { %906 = vst [vmem:[#allocation2 + $0x38] sm:$0xff] %v874_v41  ;;  %v799_v48 = vadd.f32 %v798_v47, %v637_v44 }
 0x1b2   : > { %v875_v49 = vadd.f32 %v797_v45, %v329_v42  ;;  %v641_v50 = vpop.f32.mrb[10].mxu1  ;;  %v342_v42 = vld [vmem:[#allocation2 + $0xa8] sm:$0xff] }
 0x1b3   : > { %v876_v51 = vadd.f32 %v799_v48, %v330_v46  ;;  %v802_v53 = vpop.f32.mrb[10].mxu0  ;;  %v643_v54 = vpop.f32.mrb[11].mxu1  ;;  %v343_v48 = vld [vmem:[#allocation2 + $0xb0] sm:$0xff] }
 0x1b4   : > { %907 = vst [vmem:[#allocation2 + $0x40] sm:$0xff] %v875_v49  ;;  %v803_v55 = vadd.f32 %v802_v53, %v641_v50  ;;  %v804_v57 = vpop.f32.mrb[11].mxu0 }
 0x1b5   : > { %908 = vst [vmem:[#allocation2 + $0x48] sm:$0xff] %v876_v51  ;;  %v805_v58 = vadd.f32 %v804_v57, %v643_v54 }
 0x1b6   : > { %v877_v59 = vadd.f32 %v803_v55, %v331_v52  ;;  %v647_v60 = vpop.f32.mrb[12].mxu1  ;;  %v344_v52 = vld [vmem:[#allocation2 + $0xb8] sm:$0xff] }
 0x1b7   : > { %v878_v61 = vadd.f32 %v805_v58, %v332_v56  ;;  %v808_v63 = vpop.f32.mrb[12].mxu0  ;;  %v649_v0 = vpop.f32.mrb[13].mxu1  ;;  %v345_v58 = vld [vmem:[#allocation2 + $0xc0] sm:$0xff] }
 0x1b8   : > { %909 = vst [vmem:[#allocation2 + $0x50] sm:$0xff] %v877_v59  ;;  %v809_v1 = vadd.f32 %v808_v63, %v647_v60  ;;  %v810_v3 = vpop.f32.mrb[13].mxu0 }
 0x1b9   : > { %910 = vst [vmem:[#allocation2 + $0x58] sm:$0xff] %v878_v61  ;;  %v811_v4 = vadd.f32 %v810_v3, %v649_v0 }
 0x1ba   : > { %v879_v5 = vadd.f32 %v809_v1, %v333_v62  ;;  %v653_v6 = vpop.f32.mrb[14].mxu1  ;;  %v346_v62 = vld [vmem:[#allocation2 + $0xc8] sm:$0xff] }
 0x1bb   : > { %v880_v7 = vadd.f32 %v811_v4, %v334_v2  ;;  %v814_v9 = vpop.f32.mrb[14].mxu0  ;;  %v655_v10 = vpop.f32.mrb[15].mxu1  ;;  %v347_v4 = vld [vmem:[#allocation2 + $0xd0] sm:$0xff] }
 0x1bc   : > { %911 = vst [vmem:[#allocation2 + $0x60] sm:$0xff] %v879_v5  ;;  %v815_v11 = vadd.f32 %v814_v9, %v653_v6  ;;  %v816_v13 = vpop.f32.mrb[15].mxu0 }
 0x1bd   : > { %912 = vst [vmem:[#allocation2 + $0x68] sm:$0xff] %v880_v7  ;;  %v817_v14 = vadd.f32 %v816_v13, %v655_v10 }
 0x1be   : > { %v881_v15 = vadd.f32 %v815_v11, %v335_v8  ;;  %v659_v16 = vpop.f32.mrb[16].mxu1  ;;  %v348_v8 = vld [vmem:[#allocation2 + $0xd8] sm:$0xff] }
 0x1bf   : > { %v882_v17 = vadd.f32 %v817_v14, %v336_v12  ;;  %v820_v19 = vpop.f32.mrb[16].mxu0  ;;  %v661_v20 = vpop.f32.mrb[17].mxu1  ;;  %v349_v14 = vld [vmem:[#allocation2 + $0xe0] sm:$0xff] }
 0x1c0   : > { %913 = vst [vmem:[#allocation2 + $0x70] sm:$0xff] %v881_v15  ;;  %v821_v21 = vadd.f32 %v820_v19, %v659_v16  ;;  %v822_v23 = vpop.f32.mrb[17].mxu0 }
 0x1c1   : > { %914 = vst [vmem:[#allocation2 + $0x78] sm:$0xff] %v882_v17  ;;  %v823_v24 = vadd.f32 %v822_v23, %v661_v20 }
 0x1c2   : > { %v883_v25 = vadd.f32 %v821_v21, %v337_v18  ;;  %v665_v26 = vpop.f32.mrb[18].mxu1  ;;  %v350_v18 = vld [vmem:[#allocation2 + $0xe8] sm:$0xff] }
 0x1c3   : > { %v884_v27 = vadd.f32 %v823_v24, %v338_v22  ;;  %v826_v29 = vpop.f32.mrb[18].mxu0  ;;  %v667_v30 = vpop.f32.mrb[19].mxu1  ;;  %v351_v24 = vld [vmem:[#allocation2 + $0xf0] sm:$0xff] }
 0x1c4   : > { %915 = vst [vmem:[#allocation2 + $0x80] sm:$0xff] %v883_v25  ;;  %v827_v31 = vadd.f32 %v826_v29, %v665_v26  ;;  %v828_v33 = vpop.f32.mrb[19].mxu0 }
 0x1c5   : > { %916 = vst [vmem:[#allocation2 + $0x88] sm:$0xff] %v884_v27  ;;  %v829_v34 = vadd.f32 %v828_v33, %v667_v30  ;;  %v969_v33 = vlaneseq (!%p1210_p7) }
 0x1c6   : > { %v885_v35 = vadd.f32 %v827_v31, %v339_v28  ;;  %v671_v36 = vpop.f32.mrb[20].mxu1  ;;  %v352_v28 = vld [vmem:[#allocation2 + $0xf8] sm:$0xff] }
 0x1c7   : > { %v886_v37 = vadd.f32 %v829_v34, %v340_v32  ;;  %v832_v39 = vpop.f32.mrb[20].mxu0  ;;  %v673_v40 = vpop.f32.mrb[21].mxu1  ;;  %v967_v34 = vld [vmem:[%s2414_s28] sm:$0x3] (!%p1210_p7) }
 0x1c8   : > { %917 = vst [vmem:[#allocation2 + $0x90] sm:$0xff] %v885_v35  ;;  %v833_v41 = vadd.f32 %v832_v39, %v671_v36  ;;  %v834_v43 = vpop.f32.mrb[21].mxu0  ;;  %v970_v35 = vshrl.u32 (!%p1210_p7), %v969_v33, 7  ;;  %v935_v36 = vld [vmem:[#allocation2] sm:$0xff] (!%p1210_p7)  ;;  %v938_v39 = vld [vmem:[#allocation2 + $0x18] sm:$0xff] (!%p1210_p7) }
 0x1c9   : > { %918 = vst [vmem:[#allocation2 + $0x98] sm:$0xff] %v886_v37  ;;  %v835_v44 = vadd.f32 %v834_v43, %v673_v40  ;;  %v936_v37 = vld [vmem:[#allocation2 + $0x8] sm:$0xff] (!%p1210_p7) }
 0x1ca   : > { %v887_v45 = vadd.f32 %v833_v41, %v341_v38  ;;  %v677_v46 = vpop.f32.mrb[22].mxu1  ;;  %v937_v38 = vld [vmem:[#allocation2 + $0x10] sm:$0xff] (!%p1210_p7)  ;;  %v971_v40 = vsub.s32 (!%p1210_p7), 0, %v970_v35  ;;  %v975_v41 = vsub.s32 (!%p1210_p7), 1, %v970_v35  ;;  %v940_v43 = vld [vmem:[#allocation2 + $0x28] sm:$0xff] (!%p1210_p7) }
 0x1cb   : > { %v888_v47 = vadd.f32 %v835_v44, %v342_v42  ;;  %v838_v49 = vpop.f32.mrb[22].mxu0  ;;  %v679_v50 = vpop.f32.mrb[23].mxu1  ;;  %v939_v42 = vld [vmem:[#allocation2 + $0x20] sm:$0xff] (!%p1210_p7)  ;;  %v941_v44 = vld [vmem:[#allocation2 + $0x30] sm:$0xff] (!%p1210_p7) }
 0x1cc   : > { %919 = vst [vmem:[#allocation2 + $0xa0] sm:$0xff] %v887_v45  ;;  %v839_v51 = vadd.f32 %v838_v49, %v677_v46  ;;  %v840_v53 = vpop.f32.mrb[23].mxu0  ;;  %v942_v45 = vld [vmem:[#allocation2 + $0x38] sm:$0xff] (!%p1210_p7)  ;;  %v943_v46 = vld [vmem:[#allocation2 + $0x40] sm:$0xff] (!%p1210_p7)  ;;  %v2225_v49 = vrot.slane (!%p1210_p7), %v967_v34, %v971_v40 }
 0x1cd   : > { %920 = vst [vmem:[#allocation2 + $0xa8] sm:$0xff] %v888_v47  ;;  %v841_v54 = vadd.f32 %v840_v53, %v679_v50  ;;  %v944_v47 = vld [vmem:[#allocation2 + $0x48] sm:$0xff] (!%p1210_p7)  ;;  %v2227_v50 = vrot.slane (!%p1210_p7), %v967_v34, %v975_v41 }
 0x1ce   : > { %v889_v55 = vadd.f32 %v839_v51, %v343_v48  ;;  %v683_v56 = vpop.f32.mrb[24].mxu1  ;;  %v945_v48 = vld [vmem:[#allocation2 + $0x50] sm:$0xff] (!%p1210_p7)  ;;  %v946_v51 = vld [vmem:[#allocation2 + $0x58] sm:$0xff] (!%p1210_p7)  ;;  %v948_v53 = vld [vmem:[#allocation2 + $0x68] sm:$0xff] (!%p1210_p7) }
 0x1cf   : > { %v890_v57 = vadd.f32 %v841_v54, %v344_v52  ;;  %v844_v59 = vpop.f32.mrb[24].mxu0  ;;  %v685_v60 = vpop.f32.mrb[25].mxu1  ;;  %v947_v52 = vld [vmem:[#allocation2 + $0x60] sm:$0xff] (!%p1210_p7)  ;;  %v949_v54 = vld [vmem:[#allocation2 + $0x70] sm:$0xff] (!%p1210_p7) }
 0x1d0   : > { %921 = vst [vmem:[#allocation2 + $0xb0] sm:$0xff] %v889_v55  ;;  %v845_v61 = vadd.f32 %v844_v59, %v683_v56  ;;  %v846_v63 = vpop.f32.mrb[25].mxu0  ;;  %v950_v55 = vld [vmem:[#allocation2 + $0x78] sm:$0xff] (!%p1210_p7)  ;;  %v951_v56 = vld [vmem:[#allocation2 + $0x80] sm:$0xff] (!%p1210_p7)  ;;  %v981_v59 = vadd.f32 (!%p1210_p7), %v2225_v49, %v937_v38 }
 0x1d1   : > { %922 = vst [vmem:[#allocation2 + $0xb8] sm:$0xff] %v890_v57  ;;  %v847_v0 = vadd.f32 %v846_v63, %v685_v60  ;;  %v979_v57 = vadd.f32 (!%p1210_p7), %v2225_v49, %v935_v36  ;;  %v982_v60 = vadd.f32 (!%p1210_p7), %v2227_v50, %v938_v39  ;;  %v954_v63 = vld [vmem:[#allocation2 + $0x98] sm:$0xff] (!%p1210_p7) }
 0x1d2   : > { %v891_v1 = vadd.f32 %v845_v61, %v345_v58  ;;  %v689_v2 = vpop.f32.mrb[26].mxu1  ;;  %v980_v58 = vadd.f32 (!%p1210_p7), %v2227_v50, %v936_v37  ;;  %v952_v61 = vld [vmem:[#allocation2 + $0x88] sm:$0xff] (!%p1210_p7)  ;;  %1013 = vst [vmem:[%s2026_s6 + $0x10] sm:$0xff] (!%p1210_p7), %v981_v59 }
 0x1d3   : > { %v892_v3 = vadd.f32 %v847_v0, %v346_v62  ;;  %v850_v5 = vpop.f32.mrb[26].mxu0  ;;  %v691_v6 = vpop.f32.mrb[27].mxu1  ;;  %v953_v62 = vld [vmem:[#allocation2 + $0x90] sm:$0xff] (!%p1210_p7)  ;;  %v983_v0 = vadd.f32 (!%p1210_p7), %v2225_v49, %v939_v42  ;;  %1011 = vst [vmem:[%s2026_s6] sm:$0xff] (!%p1210_p7), %v979_v57  ;;  %1014 = vst [vmem:[%s2026_s6 + $0x18] sm:$0xff] (!%p1210_p7), %v982_v60 }
 0x1d4   : > { %923 = vst [vmem:[#allocation2 + $0xc0] sm:$0xff] %v891_v1  ;;  %v851_v7 = vadd.f32 %v850_v5, %v689_v2  ;;  %v852_v9 = vpop.f32.mrb[27].mxu0  ;;  %v984_v1 = vadd.f32 (!%p1210_p7), %v2227_v50, %v940_v43  ;;  %v985_v2 = vadd.f32 (!%p1210_p7), %v2225_v49, %v941_v44  ;;  %v956_v5 = vld [vmem:[#allocation2 + $0xa8] sm:$0xff] (!%p1210_p7)  ;;  %1012 = vst [vmem:[%s2026_s6 + $0x8] sm:$0xff] (!%p1210_p7), %v980_v58 }
 0x1d5   : > { %924 = vst [vmem:[#allocation2 + $0xc8] sm:$0xff] %v892_v3  ;;  %v853_v10 = vadd.f32 %v852_v9, %v691_v6  ;;  %v986_v3 = vadd.f32 (!%p1210_p7), %v2227_v50, %v942_v45  ;;  %v989_v9 = vadd.f32 (!%p1210_p7), %v2225_v49, %v945_v48  ;;  %1015 = vst [vmem:[%s2026_s6 + $0x20] sm:$0xff] (!%p1210_p7), %v983_v0 }
 0x1d6   : > { %v893_v11 = vadd.f32 %v851_v7, %v347_v4  ;;  %v695_v12 = vpop.f32.mrb[28].mxu1  ;;  %v955_v4 = vld [vmem:[#allocation2 + $0xa0] sm:$0xff] (!%p1210_p7)  ;;  %v987_v7 = vadd.f32 (!%p1210_p7), %v2225_v49, %v943_v46  ;;  %1016 = vst [vmem:[%s2026_s6 + $0x28] sm:$0xff] (!%p1210_p7), %v984_v1  ;;  %1017 = vst [vmem:[%s2026_s6 + $0x30] sm:$0xff] (!%p1210_p7), %v985_v2 }
 0x1d7   : > { %v894_v13 = vadd.f32 %v853_v10, %v348_v8  ;;  %v856_v15 = vpop.f32.mrb[28].mxu0  ;;  %v697_v16 = vpop.f32.mrb[29].mxu1  ;;  %v957_v6 = vld [vmem:[#allocation2 + $0xb0] sm:$0xff] (!%p1210_p7)  ;;  %v988_v8 = vadd.f32 (!%p1210_p7), %v2227_v50, %v944_v47  ;;  %v990_v10 = vadd.f32 (!%p1210_p7), %v2227_v50, %v946_v51  ;;  %1018 = vst [vmem:[%s2026_s6 + $0x38] sm:$0xff] (!%p1210_p7), %v986_v3  ;;  %1021 = vst [vmem:[%s2026_s6 + $0x50] sm:$0xff] (!%p1210_p7), %v989_v9 }
 0x1d8   : > { %925 = vst [vmem:[#allocation2 + $0xd0] sm:$0xff] %v893_v11  ;;  %v857_v17 = vadd.f32 %v856_v15, %v695_v12  ;;  %v858_v19 = vpop.f32.mrb[29].mxu0  ;;  %v958_v11 = vld [vmem:[#allocation2 + $0xb8] sm:$0xff] (!%p1210_p7)  ;;  %v992_v15 = vadd.f32 (!%p1210_p7), %v2227_v50, %v948_v53  ;;  %1019 = vst [vmem:[%s2026_s6 + $0x40] sm:$0xff] (!%p1210_p7), %v987_v7 }
 0x1d9   : > { %926 = vst [vmem:[#allocation2 + $0xd8] sm:$0xff] %v894_v13  ;;  %v859_v20 = vadd.f32 %v858_v19, %v697_v16  ;;  %v993_v16 = vadd.f32 (!%p1210_p7), %v2225_v49, %v949_v54  ;;  %1020 = vst [vmem:[%s2026_s6 + $0x48] sm:$0xff] (!%p1210_p7), %v988_v8 }
 0x1da   : > { %v895_v21 = vadd.f32 %v857_v17, %v349_v14  ;;  %v701_v22 = vpop.f32.mrb[30].mxu1  ;;  %v991_v14 = vadd.f32 (!%p1210_p7), %v2225_v49, %v947_v52  ;;  %v994_v17 = vadd.f32 (!%p1210_p7), %v2227_v50, %v950_v55  ;;  %1022 = vst [vmem:[%s2026_s6 + $0x58] sm:$0xff] (!%p1210_p7), %v990_v10  ;;  %1024 = vst [vmem:[%s2026_s6 + $0x68] sm:$0xff] (!%p1210_p7), %v992_v15 }
 0x1db   : > { %v896_v23 = vadd.f32 %v859_v20, %v350_v18  ;;  %v862_v25 = vpop.f32.mrb[30].mxu0  ;;  %v703_v26 = vpop.f32.mrb[31].mxu1  ;;  %934 = sbr.rel (%p1210_p7) target bundleno = 492 (0x1ec), region = 48  ;;  %v959_v12 = vld [vmem:[#allocation2 + $0xc0] sm:$0xff] (!%p1210_p7)  ;;  %1025 = vst [vmem:[%s2026_s6 + $0x70] sm:$0xff] (!%p1210_p7), %v993_v16 }
 0x1dc   : > { %927 = vst [vmem:[#allocation2 + $0xe0] sm:$0xff] %v895_v21  ;;  %v863_v27 = vadd.f32 %v862_v25, %v701_v22  ;;  %v864_v29 = vpop.f32.mrb[31].mxu0  ;;  %v960_v13 = vld [vmem:[#allocation2 + $0xc8] sm:$0xff] (!%p1210_p7)  ;;  %v995_v21 = vadd.f32 (!%p1210_p7), %v2225_v49, %v951_v56  ;;  %v996_v22 = vadd.f32 (!%p1210_p7), %v2227_v50, %v952_v61  ;;  %1023 = vst [vmem:[%s2026_s6 + $0x60] sm:$0xff] (!%p1210_p7), %v991_v14 }
 0x1dd   : > { %928 = vst [vmem:[#allocation2 + $0xe8] sm:$0xff] %v896_v23  ;;  %v865_v30 = vadd.f32 %v864_v29, %v703_v26  ;;  %v997_v23 = vadd.f32 (!%p1210_p7), %v2225_v49, %v953_v62  ;;  %1026 = vst [vmem:[%s2026_s6 + $0x78] sm:$0xff] (!%p1210_p7), %v994_v17  ;;  %v1000_v29 = vadd.f32 (!%p1210_p7), %v2227_v50, %v956_v5 }
 0x1de   : > { %v897_v31 = vadd.f32 %v863_v27, %v351_v24  ;;  %v998_v24 = vadd.f32 (!%p1210_p7), %v2227_v50, %v954_v63  ;;  %1027 = vst [vmem:[%s2026_s6 + $0x80] sm:$0xff] (!%p1210_p7), %v995_v21  ;;  %1028 = vst [vmem:[%s2026_s6 + $0x88] sm:$0xff] (!%p1210_p7), %v996_v22  ;;  %v1004_v33 = vadd.f32 (!%p1210_p7), %v2227_v50, %v960_v13 }
 0x1df   : > { %v898_v32 = vadd.f32 %v865_v30, %v352_v28  ;;  %v961_v18 = vld [vmem:[#allocation2 + $0xd0] sm:$0xff] (!%p1210_p7)  ;;  %v999_v28 = vadd.f32 (!%p1210_p7), %v2225_v49, %v955_v4  ;;  %v1001_v30 = vadd.f32 (!%p1210_p7), %v2225_v49, %v957_v6  ;;  %1029 = vst [vmem:[%s2026_s6 + $0x90] sm:$0xff] (!%p1210_p7), %v997_v23  ;;  %1032 = vst [vmem:[%s2026_s6 + $0xa8] sm:$0xff] (!%p1210_p7), %v1000_v29 }
 0x1e0   : > { %929 = vst [vmem:[#allocation2 + $0xf0] sm:$0xff] %v897_v31  ;;  %v962_v19 = vld [vmem:[#allocation2 + $0xd8] sm:$0xff] (!%p1210_p7)  ;;  %v1002_v31 = vadd.f32 (!%p1210_p7), %v2227_v50, %v958_v11  ;;  %1030 = vst [vmem:[%s2026_s6 + $0x98] sm:$0xff] (!%p1210_p7), %v998_v24  ;;  %v1005_v34 = vadd.f32 (!%p1210_p7), %v2225_v49, %v961_v18 }
 0x1e1   : > { %930 = vst [vmem:[#allocation2 + $0xf8] sm:$0xff] %v898_v32  ;;  %v1003_v32 = vadd.f32 (!%p1210_p7), %v2225_v49, %v959_v12  ;;  %v1006_v35 = vadd.f32 (!%p1210_p7), %v2227_v50, %v962_v19  ;;  %1031 = vst [vmem:[%s2026_s6 + $0xa0] sm:$0xff] (!%p1210_p7), %v999_v28 }
 0x1e2   : > { %1033 = vst [vmem:[%s2026_s6 + $0xb0] sm:$0xff] %v1001_v30  ;;  %1034 = vst [vmem:[%s2026_s6 + $0xb8] sm:$0xff] %v1002_v31 }
 0x1e3   : > { %v963_v20 = vld [vmem:[#allocation2 + $0xe0] sm:$0xff]  ;;  %1035 = vst [vmem:[%s2026_s6 + $0xc0] sm:$0xff] %v1003_v32  ;;  %1036 = vst [vmem:[%s2026_s6 + $0xc8] sm:$0xff] %v1004_v33 }
 0x1e4   : > { %v964_v25 = vld [vmem:[#allocation2 + $0xe8] sm:$0xff]  ;;  %v1007_v36 = vadd.f32 %v2225_v49, %v963_v20  ;;  %1037 = vst [vmem:[%s2026_s6 + $0xd0] sm:$0xff] %v1005_v34  ;;  %1038 = vst [vmem:[%s2026_s6 + $0xd8] sm:$0xff] %v1006_v35 }
 0x1e5   : > { %v1008_v37 = vadd.f32 %v2227_v50, %v964_v25 }
 0x1e6   : > { %1039 = vst [vmem:[%s2026_s6 + $0xe0] sm:$0xff] %v1007_v36 }
 0x1e7   : > { %v965_v26 = vld [vmem:[#allocation2 + $0xf0] sm:$0xff]  ;;  %1040 = vst [vmem:[%s2026_s6 + $0xe8] sm:$0xff] %v1008_v37 }
 0x1e8   : > { %v966_v27 = vld [vmem:[#allocation2 + $0xf8] sm:$0xff]  ;;  %v1009_v38 = vadd.f32 %v2225_v49, %v965_v26 }
 0x1e9   : > { %v1010_v39 = vadd.f32 %v2227_v50, %v966_v27 }
 0x1ea   : > { %1041 = vst [vmem:[%s2026_s6 + $0xf0] sm:$0xff] %v1009_v38 }
 0x1eb   : > { %1042 = vst [vmem:[%s2026_s6 + $0xf8] sm:$0xff] %v1010_v39 }
 0x1ec PF: > { %s2415_s11 = sld [smem:[#allocation13_spill]]  ;;  %s2416_s26 = sld [smem:[#allocation17_spill]] }
 0x1ed   : > { %s1060_s5 = sshll.u32 %s2026_s6, 4  ;;  %s2304_s27 = scalar_lea.sflag [#allocation5], %s271_s21  ;;  %s2300_s5 = int_to_ptr.vmem [resolvable:$true] %s1060_s5 }
 0x1ee   : > { %s1581_s29 = scalar_lea.vmem %s2300_s5, 4096  ;;  %p2417_p0 = scmp.ne.s32.totalorder %s2406_s18, 0 }
 0x1ef   : > { %p1582_p12 = scmp.ne.s32.totalorder %s2300_s5, %s1581_s29  ;;  %s1741_s7 = smov [#allocation8]  }
 0x1f0   : > { %s1585_s30 = sshll.u32 %s1741_s7, 4  ;;  %s1586_s30 = int_to_ptr.vmem [resolvable:$false] %s1585_s30 }
 0x1f1   : > { %p1583_p10 = pnand %p1582_p12, %p2417_p0  ;;  %s1587_s28 = scalar_lea.vmem %s1586_s30, 8192 }
 0x1f2   : > { %s1221_s15 = sshll.u32 %s2415_s11, 12  ;;  %p1588_p6 = scmp.lt.s32.totalorder %s2300_s5, %s1586_s30 }
 0x1f3   : > { %s2297_s4 = scalar_lea.hbm %s2416_s26, %s1221_s15  ;;  %p1584_p3 = pneg %p1583_p10 }
 0x1f4   : > { %p1589_p9 = scmp.lt.s32.totalorder %s1587_s28, %s1581_s29 }
 0x1f6   : > { %p1590_p1 = por %p1589_p9, %p1588_p6 }
 0x1f8   : > { %p1591_p11 = pnand %p1590_p1, %p1584_p3 }
 0x1fa   : > { %1594 = shalt.err (!%p1591_p11)
}
 0x1fb   : > { %s1595_s21 = scalar_lea.hbm %s2297_s4, 4096  ;;  %s1599_s15 = scalar_lea.hbm %s2416_s26, 8192 }
 0x1fc   : > { %p1596_p4 = scmp.ne.s32.totalorder %s2297_s4, %s1595_s21  ;;  %p1600_p5 = scmp.lt.u32.totalorder %s2297_s4, %s2416_s26 }
 0x1fd   : > { %p1601_p13 = scmp.lt.u32.totalorder %s1599_s15, %s1595_s21  ;;  %p1603_p12 = scmp.lt.u32.totalorder %s1595_s21, %s2297_s4 }
 0x1fe   : > { %p1597_p2 = pnand %p1596_p4, %p2417_p0 }
 0x1ff   : > { %p1602_p7 = por %p1601_p13, %p1600_p5 }
 0x200   : > { %p1598_p8 = pneg %p1597_p2 }
 0x201   : > { %p1604_p10 = por %p1603_p12, %p1602_p7 }
 0x203   : > { %p1605_p3 = pnand %p1604_p10, %p1598_p8 }
 0x205   : > { %1608 = shalt.err (!%p1605_p3)
}
 0x206   : > { %s1742_s29 = smov 256   ;;  %s1743_s7 = smov 16  }
 0x207   : > { %1386 = dma.vmem_to_hbm [thread:$0]  (%p2417_p0), %s2300_s5, 4096, %s2297_s4, %s2304_s27, %s1742_s29, %s1742_s29, %s1743_s7  }
 0x208 PF: > { %p1400_p6 = scmp.ge.s32.totalorder %s1731_s25, 2  ;;  %s1075_s30 = sand.u32 1, %s1679_s12  }
 0x209   : > { %p2418_p9 = scmp.ne.s32.totalorder %s2407_s3, 0  ;;  %s1076_s28 = scalar_lea.sflag [#allocation5], %s1075_s30 }
 0x20b   : > { %p1396_p1 = pnand %p1400_p6, %p2418_p9 }
 0x20d   : > { %1674 = dma.done.wait (!%p1396_p1), %s1076_s28, 4096  }
 0x20e   : > { %1676 = vsyncadd (!%p1396_p1), %s1076_s28, 4294963200  ;;  %s22_s25 = sadd.s32 1, %s1731_s25   ;;  %s2420_s3 = sld [smem:[#allocation14_spill]] }
 0x20f   : > { %p2333_p11 = scmp.ge.s32.totalorder %s22_s25, 6   ;;  %s2421_s4 = sld [smem:[#allocation15_spill]] }
 0x210   : > { %s2423_s12 = smov %s1683_s13  ;;  %s2424_s13 = smov %s1687_s14 }
 0x211   : > { %s2425_s14 = smov %s1864_s9  ;;  %s2426_s15 = smov %s1695_s16 }
 0x212   : > { %s2427_s16 = smov %s1699_s17  ;;  %s2428_s17 = smov %s1938_s22 }
 0x213   : > { %s2429_s18 = smov %s1707_s19  ;;  %s2430_s19 = smov %s1711_s20 }
 0x214   : > { %s2431_s20 = smov %s1867_s10  ;;  %s2432_s21 = smov %s1723_s23 }
 0x215   : > { %s2433_s22 = smov %s1727_s24  ;;  %s2434_s23 = smov %s2420_s3 }
 0x216   : > { %s2435_s24 = smov %s2421_s4  ;;  %21 = sbr.rel (!%p2333_p11) target bundleno = 15 (0xf), region = 101 }
 0x21d   :  { %1081 = vsyncpa [#allocation4], 1 }
 0x21e   :  { %1083 = vsyncpa [#allocation4 + $0x1], 1 }
 0x21f   :  { %1084 = vsyncpa [#allocation7], 1 }
 0x220   :  { %1086 = vsyncpa [#allocation7 + $0x1], 1 }
 0x221   :  { %1087 = vsyncpa [#allocation5], 1 }
 0x222   :  { %1089 = vsyncpa [#allocation5 + $0x1], 1 }

</bundles_post_ra>
